<compile_context>
chip_gen: v5e
topology: v5e:2x2
jax: 0.10.0
libtpu: 0.0.40
codegen_flags: <defaults>
</compile_context>

<pallas_src>
from functools import partial

import jax
import jax.numpy as jnp
import numpy as np
from jax.experimental import pallas as pl
from jax.experimental.pallas import tpu as pltpu


def highway_output_kernel(x_ref, m1_ref, m2_ref, waT_ref, ba_ref, wcT_ref, bc_ref,
                          o_ref, p1_ref, p2_ref, *, H, W, Cin, C2, Cout, BB):
    # x_ref  : (BB, Cin, HW + 2*PAD1)  channel-major flat input, lane-padded
    # m1_ref : (5, HW + 2*PAD1)        column-wrap masks for dx in -2..2 (input coords)
    # m2_ref : (3, HW + 2*PAD2)        column-wrap masks for dx in -1..1
    # waT_ref: (C2, 25*Cin)            fused [conv5x5 | lifted conv3x3] weight, transposed
    # ba_ref : (C2, 1)
    # wcT_ref: (Cout, 9*C2)            concat_conv weight, transposed
    # bc_ref : (Cout, 1)
    # o_ref  : (BB, Cout, HW)          lane-dense output (reshape -> NCHW in wrapper)
    # p1_ref : VMEM (25*Cin, BB*HW)    stage-1 patch matrix (fully rewritten each step)
    # p2_ref : VMEM (9*C2,  BB*HW)    stage-2 patch matrix (fully rewritten each step)
    HW = H * W
    PAD1 = 2 * W + 2          # covers |dy*W + dx| for the 5x5 (pad=2) taps
    PAD2 = W + 1              # covers |dy*W + dx| for the 3x3 (pad=1) taps
    f32 = jnp.float32

    # ---- stage 1: fused [conv5x5 | 3x3-lifted-to-5x5]: build P1, ONE transposed dot ----
    for b in range(BB):
        x = x_ref[b]                                            # (Cin, HW + 2*PAD1)
        # One pre-masked copy per horizontal offset dx: the column-wrap mask depends
        # only on dx (not dy), so 4 vector muls replace 20 per-tap masks.
        xm = {0: x}
        for dx in (-2, -1, 1, 2):
            xm[dx] = x * m1_ref[dx + 2:dx + 3, :]
        t = 0
        for dy in (-2, -1, 0, 1, 2):
            for dx in (-2, -1, 0, 1, 2):
                s = PAD1 + dy * W + dx
                p1_ref[t * Cin:(t + 1) * Cin, b * HW:(b + 1) * HW] = \
                    xm[dx][:, s:s + HW]
                t += 1

    mid = jnp.dot(waT_ref[...], p1_ref[...], preferred_element_type=f32)
    mid = mid + ba_ref[...]                                     # (C2, BB*HW), lane-dense

    # ---- stage 2: concat_conv 3x3: build P2, ONE transposed dot, bias + tanh ----
    for b in range(BB):
        midb = mid[:, b * HW:(b + 1) * HW]                      # 128-aligned lane slice
        zpad = jnp.zeros((C2, PAD2), f32)
        midp = jnp.concatenate([zpad, midb, zpad], axis=1)      # (C2, HW + 2*PAD2)
        mm = {0: midp}
        for dx in (-1, 1):
            mm[dx] = midp * m2_ref[dx + 1:dx + 2, :]
        t = 0
        for dy in (-1, 0, 1):
            for dx in (-1, 0, 1):
                s = PAD2 + dy * W + dx
                p2_ref[t * C2:(t + 1) * C2, b * HW:(b + 1) * HW] = \
                    mm[dx][:, s:s + HW]
                t += 1

    out = jnp.dot(wcT_ref[...], p2_ref[...], preferred_element_type=f32)
    out = jnp.tanh(out + bc_ref[...])                           # (Cout, BB*HW), 2 vregs
    for b in range(BB):
        o_ref[b] = out[:, b * HW:(b + 1) * HW].astype(o_ref.dtype)


def _col_wrap_masks(dxs, pad, length, W, dtype):
    """Masks (in padded, flat input coordinates) that zero columns whose horizontal
    tap offset dx would wrap across an image row.  Built once in the wrapper."""
    xcol = jnp.mod(jnp.arange(length) - pad, W)
    rows = []
    for dx in dxs:
        if dx > 0:
            valid = xcol >= dx
        elif dx < 0:
            valid = xcol < W + dx
        else:
            valid = jnp.ones((length,), dtype=bool)
        rows.append(valid.astype(dtype))
    return jnp.stack(rows, axis=0)


@partial(jax.jit, static_argnames=("batch_block",))
def highway_output_2d(x_nchw, params, batch_block=None):
    """x_nchw: (N, Cin, H, W) float32.  Returns (N, Cout, H, W)."""
    w5, b5, w3, b3, wc, bc = params
    N, Cin, H, W = x_nchw.shape
    Cmid = w5.shape[-1]
    C2 = 2 * Cmid
    Cout = wc.shape[-1]
    HW = H * W
    PAD1 = 2 * W + 2
    PAD2 = W + 1

    if batch_block is None:
        # Amortize the ~0.35us per-grid-step overhead, but keep >= 2 grid blocks so a
        # v7x megacore can shard the "parallel" axis across both TensorCores.
        batch_block = max([d for d in range(1, max(N // 2, 1) + 1) if N % d == 0])
    assert N % batch_block == 0
    BB = batch_block

    # ---- input: NCHW -> (N, Cin, H*W) channel-major flat (free reshape) + lane pad ----
    x_flat = x_nchw.reshape(N, Cin, HW)
    x_pad = jnp.pad(x_flat, ((0, 0), (0, 0), (PAD1, PAD1)))

    # ---- weights: fuse 3x3 branch into the 5x5 footprint; im2col layout, transposed ----
    # conv3x3(pad=1) == conv5x5(pad=2) with the 3x3 kernel zero-padded to 5x5 (exact, f32).
    w3p = jnp.pad(w3, ((1, 1), (1, 1), (0, 0), (0, 0)))                 # (5,5,Cin,Cmid)
    waT = jnp.concatenate([w5, w3p], axis=-1).reshape(25 * Cin, C2).T    # (C2, 25*Cin)
    baT = jnp.concatenate([b5, b3], axis=-1).reshape(C2, 1)
    wcT = wc.reshape(9 * C2, Cout).T                                     # (Cout, 9*C2)
    bcT = bc.reshape(Cout, 1)

    # ---- per-dx column-wrap masks (compile-time constants) ----
    m1 = _col_wrap_masks((-2, -1, 0, 1, 2), PAD1, HW + 2 * PAD1, W, x_nchw.dtype)
    m2 = _col_wrap_masks((-1, 0, 1), PAD2, HW + 2 * PAD2, W, x_nchw.dtype)

    kernel = partial(highway_output_kernel,
                     H=H, W=W, Cin=Cin, C2=C2, Cout=Cout, BB=BB)

    out = pl.pallas_call(
        kernel,
        out_shape=jax.ShapeDtypeStruct((N, Cout, HW), x_nchw.dtype),
        grid_spec=pltpu.PrefetchScalarGridSpec(
            num_scalar_prefetch=0,
            grid=(N // BB,),
            in_specs=[
                pl.BlockSpec((BB, Cin, HW + 2 * PAD1), lambda n: (n, 0, 0)),
                pl.BlockSpec((5, HW + 2 * PAD1), lambda n: (0, 0)),
                pl.BlockSpec((3, HW + 2 * PAD2), lambda n: (0, 0)),
                pl.BlockSpec((C2, 25 * Cin), lambda n: (0, 0)),
                pl.BlockSpec((C2, 1), lambda n: (0, 0)),
                pl.BlockSpec((Cout, 9 * C2), lambda n: (0, 0)),
                pl.BlockSpec((Cout, 1), lambda n: (0, 0)),
            ],
            out_specs=pl.BlockSpec((BB, Cout, HW), lambda n: (n, 0, 0)),
            scratch_shapes=[
                pltpu.VMEM((25 * Cin, BB * HW), jnp.float32),
                pltpu.VMEM((9 * C2, BB * HW), jnp.float32),
            ],
        ),
        compiler_params=pltpu.CompilerParams(
            dimension_semantics=("parallel",)),
    )(x_pad, m1, m2, waT, baT, wcT, bcT)

    # (N, Cout, H*W) is already channel-major: a pure reshape gives NCHW.
    return out.reshape(N, Cout, H, W)


def init_params(key, in_channels, out_channels):
    """Deterministic PyTorch-Conv2d-style (kaiming-uniform-ish) init, HWIO weights."""
    c_mid = in_channels // 2  # use_highway=False path

    def conv_init(key, kh, kw, cin, cout):
        kw_key, kb_key = jax.random.split(key)
        fan_in = cin * kh * kw
        bound = 1.0 / np.sqrt(fan_in)
        w = jax.random.uniform(kw_key, (kh, kw, cin, cout), jnp.float32,
                               minval=-bound, maxval=bound)
        b = jax.random.uniform(kb_key, (1, cout), jnp.float32,
                               minval=-bound, maxval=bound)
        return w, b

    k5, k3, kc = jax.random.split(key, 3)
    w5, b5 = conv_init(k5, 5, 5, in_channels, c_mid)
    w3, b3 = conv_init(k3, 3, 3, in_channels, c_mid)
    wc, bc = conv_init(kc, 3, 3, 2 * c_mid, out_channels)
    return (w5, b5, w3, b3, wc, bc)


def reference_forward(x_nchw, params):
    """Pure-JAX reference identical to the PyTorch module (use_highway=False, act=tanh)."""
    w5, b5, w3, b3, wc, bc = params
    dn = ('NCHW', 'HWIO', 'NCHW')
    c5 = jax.lax.conv_general_dilated(x_nchw, w5, (1, 1), ((2, 2), (2, 2)),
                                      dimension_numbers=dn) + b5.reshape(1, -1, 1, 1)
    c3 = jax.lax.conv_general_dilated(x_nchw, w3, (1, 1), ((1, 1), (1, 1)),
                                      dimension_numbers=dn) + b3.reshape(1, -1, 1, 1)
    cat = jnp.concatenate([c5, c3], axis=1)
    out = jax.lax.conv_general_dilated(cat, wc, (1, 1), ((1, 1), (1, 1)),
                                       dimension_numbers=dn) + bc.reshape(1, -1, 1, 1)
    return jnp.tanh(out)


if __name__ == "__main__":
    N, Cin, Cout, H, W = 2, 4, 8, 16, 16

    key = jax.random.PRNGKey(0)
    kx, kp = jax.random.split(key)
    x = jax.random.normal(kx, (N, Cin, H, W), jnp.float32)
    params = init_params(kp, Cin, Cout)

    out = highway_output_2d(x, params)
    out = jax.block_until_ready(out)

    ref = jax.block_until_ready(reference_forward(x, params))
    np.testing.assert_allclose(np.asarray(out), np.asarray(ref),
                               rtol=1e-4, atol=1e-4)

    print("KERNEL_OK")
</pallas_src>

<mosaic_0001>
module attributes {stable_mosaic.version = 11 : i64} {
  func.func @highway_output_kernel(%arg0: i32, %arg1: memref<1x4x324xf32, #tpu.memory_space<vmem>>, %arg2: memref<5x324xf32, #tpu.memory_space<vmem>>, %arg3: memref<3x290xf32, #tpu.memory_space<vmem>>, %arg4: memref<4x100xf32, #tpu.memory_space<vmem>>, %arg5: memref<4x1xf32, #tpu.memory_space<vmem>>, %arg6: memref<8x36xf32, #tpu.memory_space<vmem>>, %arg7: memref<8x1xf32, #tpu.memory_space<vmem>>, %arg8: memref<1x8x256xf32, #tpu.memory_space<vmem>>, %arg9: memref<100x256xf32, #tpu.memory_space<vmem>>, %arg10: memref<36x256xf32, #tpu.memory_space<vmem>>) attributes {dimension_semantics = [#tpu.dimension_semantics<parallel>], iteration_bounds = array<i64: 2>, scalar_prefetch = 0 : i64, scratch_operands = 2 : i64, tpu.core_type = #tpu.core_type<tc>, window_params = [{transform_indices = @transform_0, window_bounds = array<i64: 1, 4, 324>}, {pipeline_mode = #tpu.pipeline_mode<synchronous>, transform_indices = @transform_1, window_bounds = array<i64: 5, 324>}, {pipeline_mode = #tpu.pipeline_mode<synchronous>, transform_indices = @transform_2, window_bounds = array<i64: 3, 290>}, {pipeline_mode = #tpu.pipeline_mode<synchronous>, transform_indices = @transform_3, window_bounds = array<i64: 4, 100>}, {pipeline_mode = #tpu.pipeline_mode<synchronous>, transform_indices = @transform_4, window_bounds = array<i64: 4, 1>}, {pipeline_mode = #tpu.pipeline_mode<synchronous>, transform_indices = @transform_5, window_bounds = array<i64: 8, 36>}, {pipeline_mode = #tpu.pipeline_mode<synchronous>, transform_indices = @transform_6, window_bounds = array<i64: 8, 1>}, {transform_indices = @transform_7, window_bounds = array<i64: 1, 8, 256>}]} {
    %c0 = arith.constant 0 : index
    %c0_0 = arith.constant 0 : index
    %c0_1 = arith.constant 0 : index
    %0 = vector.load %arg1[%c0, %c0_0, %c0_1] : memref<1x4x324xf32, #tpu.memory_space<vmem>>, vector<1x4x324xf32>
    %1 = vector.shape_cast %0 : vector<1x4x324xf32> to vector<4x324xf32>
    %c0_2 = arith.constant 0 : index
    %c0_3 = arith.constant 0 : index
    %2 = vector.load %arg2[%c0_2, %c0_3] : memref<5x324xf32, #tpu.memory_space<vmem>>, vector<1x324xf32>
    %3 = vector.broadcast %2 : vector<1x324xf32> to vector<4x324xf32>
    %4 = arith.mulf %1, %3 : vector<4x324xf32>
    %c1 = arith.constant 1 : index
    %c0_4 = arith.constant 0 : index
    %5 = vector.load %arg2[%c1, %c0_4] : memref<5x324xf32, #tpu.memory_space<vmem>>, vector<1x324xf32>
    %6 = vector.broadcast %5 : vector<1x324xf32> to vector<4x324xf32>
    %7 = arith.mulf %1, %6 : vector<4x324xf32>
    %c3 = arith.constant 3 : index
    %c0_5 = arith.constant 0 : index
    %8 = vector.load %arg2[%c3, %c0_5] : memref<5x324xf32, #tpu.memory_space<vmem>>, vector<1x324xf32>
    %9 = vector.broadcast %8 : vector<1x324xf32> to vector<4x324xf32>
    %10 = arith.mulf %1, %9 : vector<4x324xf32>
    %c4 = arith.constant 4 : index
    %c0_6 = arith.constant 0 : index
    %11 = vector.load %arg2[%c4, %c0_6] : memref<5x324xf32, #tpu.memory_space<vmem>>, vector<1x324xf32>
    %12 = vector.broadcast %11 : vector<1x324xf32> to vector<4x324xf32>
    %13 = arith.mulf %1, %12 : vector<4x324xf32>
    %14 = vector.extract_strided_slice %4 {offsets = [0, 0], sizes = [4, 256], strides = [1, 1]} : vector<4x324xf32> to vector<4x256xf32>
    %c0_7 = arith.constant 0 : index
    %c0_8 = arith.constant 0 : index
    %15 = vector.load %arg9[%c0_7, %c0_8] : memref<100x256xf32, #tpu.memory_space<vmem>>, vector<4x256xf32>
    tpu.vector_store %arg9[%c0_7, %c0_8], %14 {strides = array<i32>} : memref<100x256xf32, #tpu.memory_space<vmem>>, vector<4x256xf32>,
    %16 = vector.extract_strided_slice %7 {offsets = [0, 1], sizes = [4, 256], strides = [1, 1]} : vector<4x324xf32> to vector<4x256xf32>
    %c4_9 = arith.constant 4 : index
    %c0_10 = arith.constant 0 : index
    %17 = vector.load %arg9[%c4_9, %c0_10] : memref<100x256xf32, #tpu.memory_space<vmem>>, vector<4x256xf32>
    tpu.vector_store %arg9[%c4_9, %c0_10], %16 {strides = array<i32>} : memref<100x256xf32, #tpu.memory_space<vmem>>, vector<4x256xf32>,
    %18 = vector.extract_strided_slice %1 {offsets = [0, 2], sizes = [4, 256], strides = [1, 1]} : vector<4x324xf32> to vector<4x256xf32>
    %c8 = arith.constant 8 : index
    %c0_11 = arith.constant 0 : index
    %19 = vector.load %arg9[%c8, %c0_11] : memref<100x256xf32, #tpu.memory_space<vmem>>, vector<4x256xf32>
    tpu.vector_store %arg9[%c8, %c0_11], %18 {strides = array<i32>} : memref<100x256xf32, #tpu.memory_space<vmem>>, vector<4x256xf32>,
    %20 = vector.extract_strided_slice %10 {offsets = [0, 3], sizes = [4, 256], strides = [1, 1]} : vector<4x324xf32> to vector<4x256xf32>
    %c12 = arith.constant 12 : index
    %c0_12 = arith.constant 0 : index
    %21 = vector.load %arg9[%c12, %c0_12] : memref<100x256xf32, #tpu.memory_space<vmem>>, vector<4x256xf32>
    tpu.vector_store %arg9[%c12, %c0_12], %20 {strides = array<i32>} : memref<100x256xf32, #tpu.memory_space<vmem>>, vector<4x256xf32>,
    %22 = vector.extract_strided_slice %13 {offsets = [0, 4], sizes = [4, 256], strides = [1, 1]} : vector<4x324xf32> to vector<4x256xf32>
    %c16 = arith.constant 16 : index
    %c0_13 = arith.constant 0 : index
    %23 = vector.load %arg9[%c16, %c0_13] : memref<100x256xf32, #tpu.memory_space<vmem>>, vector<4x256xf32>
    tpu.vector_store %arg9[%c16, %c0_13], %22 {strides = array<i32>} : memref<100x256xf32, #tpu.memory_space<vmem>>, vector<4x256xf32>,
    %24 = vector.extract_strided_slice %4 {offsets = [0, 16], sizes = [4, 256], strides = [1, 1]} : vector<4x324xf32> to vector<4x256xf32>
    %c20 = arith.constant 20 : index
    %c0_14 = arith.constant 0 : index
    %25 = vector.load %arg9[%c20, %c0_14] : memref<100x256xf32, #tpu.memory_space<vmem>>, vector<4x256xf32>
    tpu.vector_store %arg9[%c20, %c0_14], %24 {strides = array<i32>} : memref<100x256xf32, #tpu.memory_space<vmem>>, vector<4x256xf32>,
    %26 = vector.extract_strided_slice %7 {offsets = [0, 17], sizes = [4, 256], strides = [1, 1]} : vector<4x324xf32> to vector<4x256xf32>
    %c24 = arith.constant 24 : index
    %c0_15 = arith.constant 0 : index
    %27 = vector.load %arg9[%c24, %c0_15] : memref<100x256xf32, #tpu.memory_space<vmem>>, vector<4x256xf32>
    tpu.vector_store %arg9[%c24, %c0_15], %26 {strides = array<i32>} : memref<100x256xf32, #tpu.memory_space<vmem>>, vector<4x256xf32>,
    %28 = vector.extract_strided_slice %1 {offsets = [0, 18], sizes = [4, 256], strides = [1, 1]} : vector<4x324xf32> to vector<4x256xf32>
    %c28 = arith.constant 28 : index
    %c0_16 = arith.constant 0 : index
    %29 = vector.load %arg9[%c28, %c0_16] : memref<100x256xf32, #tpu.memory_space<vmem>>, vector<4x256xf32>
    tpu.vector_store %arg9[%c28, %c0_16], %28 {strides = array<i32>} : memref<100x256xf32, #tpu.memory_space<vmem>>, vector<4x256xf32>,
    %30 = vector.extract_strided_slice %10 {offsets = [0, 19], sizes = [4, 256], strides = [1, 1]} : vector<4x324xf32> to vector<4x256xf32>
    %c32 = arith.constant 32 : index
    %c0_17 = arith.constant 0 : index
    %31 = vector.load %arg9[%c32, %c0_17] : memref<100x256xf32, #tpu.memory_space<vmem>>, vector<4x256xf32>
    tpu.vector_store %arg9[%c32, %c0_17], %30 {strides = array<i32>} : memref<100x256xf32, #tpu.memory_space<vmem>>, vector<4x256xf32>,
    %32 = vector.extract_strided_slice %13 {offsets = [0, 20], sizes = [4, 256], strides = [1, 1]} : vector<4x324xf32> to vector<4x256xf32>
    %c36 = arith.constant 36 : index
    %c0_18 = arith.constant 0 : index
    %33 = vector.load %arg9[%c36, %c0_18] : memref<100x256xf32, #tpu.memory_space<vmem>>, vector<4x256xf32>
    tpu.vector_store %arg9[%c36, %c0_18], %32 {strides = array<i32>} : memref<100x256xf32, #tpu.memory_space<vmem>>, vector<4x256xf32>,
    %34 = vector.extract_strided_slice %4 {offsets = [0, 32], sizes = [4, 256], strides = [1, 1]} : vector<4x324xf32> to vector<4x256xf32>
    %c40 = arith.constant 40 : index
    %c0_19 = arith.constant 0 : index
    %35 = vector.load %arg9[%c40, %c0_19] : memref<100x256xf32, #tpu.memory_space<vmem>>, vector<4x256xf32>
    tpu.vector_store %arg9[%c40, %c0_19], %34 {strides = array<i32>} : memref<100x256xf32, #tpu.memory_space<vmem>>, vector<4x256xf32>,
    %36 = vector.extract_strided_slice %7 {offsets = [0, 33], sizes = [4, 256], strides = [1, 1]} : vector<4x324xf32> to vector<4x256xf32>
    %c44 = arith.constant 44 : index
    %c0_20 = arith.constant 0 : index
    %37 = vector.load %arg9[%c44, %c0_20] : memref<100x256xf32, #tpu.memory_space<vmem>>, vector<4x256xf32>
    tpu.vector_store %arg9[%c44, %c0_20], %36 {strides = array<i32>} : memref<100x256xf32, #tpu.memory_space<vmem>>, vector<4x256xf32>,
    %38 = vector.extract_strided_slice %1 {offsets = [0, 34], sizes = [4, 256], strides = [1, 1]} : vector<4x324xf32> to vector<4x256xf32>
    %c48 = arith.constant 48 : index
    %c0_21 = arith.constant 0 : index
    %39 = vector.load %arg9[%c48, %c0_21] : memref<100x256xf32, #tpu.memory_space<vmem>>, vector<4x256xf32>
    tpu.vector_store %arg9[%c48, %c0_21], %38 {strides = array<i32>} : memref<100x256xf32, #tpu.memory_space<vmem>>, vector<4x256xf32>,
    %40 = vector.extract_strided_slice %10 {offsets = [0, 35], sizes = [4, 256], strides = [1, 1]} : vector<4x324xf32> to vector<4x256xf32>
    %c52 = arith.constant 52 : index
    %c0_22 = arith.constant 0 : index
    %41 = vector.load %arg9[%c52, %c0_22] : memref<100x256xf32, #tpu.memory_space<vmem>>, vector<4x256xf32>
    tpu.vector_store %arg9[%c52, %c0_22], %40 {strides = array<i32>} : memref<100x256xf32, #tpu.memory_space<vmem>>, vector<4x256xf32>,
    %42 = vector.extract_strided_slice %13 {offsets = [0, 36], sizes = [4, 256], strides = [1, 1]} : vector<4x324xf32> to vector<4x256xf32>
    %c56 = arith.constant 56 : index
    %c0_23 = arith.constant 0 : index
    %43 = vector.load %arg9[%c56, %c0_23] : memref<100x256xf32, #tpu.memory_space<vmem>>, vector<4x256xf32>
    tpu.vector_store %arg9[%c56, %c0_23], %42 {strides = array<i32>} : memref<100x256xf32, #tpu.memory_space<vmem>>, vector<4x256xf32>,
    %44 = vector.extract_strided_slice %4 {offsets = [0, 48], sizes = [4, 256], strides = [1, 1]} : vector<4x324xf32> to vector<4x256xf32>
    %c60 = arith.constant 60 : index
    %c0_24 = arith.constant 0 : index
    %45 = vector.load %arg9[%c60, %c0_24] : memref<100x256xf32, #tpu.memory_space<vmem>>, vector<4x256xf32>
    tpu.vector_store %arg9[%c60, %c0_24], %44 {strides = array<i32>} : memref<100x256xf32, #tpu.memory_space<vmem>>, vector<4x256xf32>,
    %46 = vector.extract_strided_slice %7 {offsets = [0, 49], sizes = [4, 256], strides = [1, 1]} : vector<4x324xf32> to vector<4x256xf32>
    %c64 = arith.constant 64 : index
    %c0_25 = arith.constant 0 : index
    %47 = vector.load %arg9[%c64, %c0_25] : memref<100x256xf32, #tpu.memory_space<vmem>>, vector<4x256xf32>
    tpu.vector_store %arg9[%c64, %c0_25], %46 {strides = array<i32>} : memref<100x256xf32, #tpu.memory_space<vmem>>, vector<4x256xf32>,
    %48 = vector.extract_strided_slice %1 {offsets = [0, 50], sizes = [4, 256], strides = [1, 1]} : vector<4x324xf32> to vector<4x256xf32>
    %c68 = arith.constant 68 : index
    %c0_26 = arith.constant 0 : index
    %49 = vector.load %arg9[%c68, %c0_26] : memref<100x256xf32, #tpu.memory_space<vmem>>, vector<4x256xf32>
    tpu.vector_store %arg9[%c68, %c0_26], %48 {strides = array<i32>} : memref<100x256xf32, #tpu.memory_space<vmem>>, vector<4x256xf32>,
    %50 = vector.extract_strided_slice %10 {offsets = [0, 51], sizes = [4, 256], strides = [1, 1]} : vector<4x324xf32> to vector<4x256xf32>
    %c72 = arith.constant 72 : index
    %c0_27 = arith.constant 0 : index
    %51 = vector.load %arg9[%c72, %c0_27] : memref<100x256xf32, #tpu.memory_space<vmem>>, vector<4x256xf32>
    tpu.vector_store %arg9[%c72, %c0_27], %50 {strides = array<i32>} : memref<100x256xf32, #tpu.memory_space<vmem>>, vector<4x256xf32>,
    %52 = vector.extract_strided_slice %13 {offsets = [0, 52], sizes = [4, 256], strides = [1, 1]} : vector<4x324xf32> to vector<4x256xf32>
    %c76 = arith.constant 76 : index
    %c0_28 = arith.constant 0 : index
    %53 = vector.load %arg9[%c76, %c0_28] : memref<100x256xf32, #tpu.memory_space<vmem>>, vector<4x256xf32>
    tpu.vector_store %arg9[%c76, %c0_28], %52 {strides = array<i32>} : memref<100x256xf32, #tpu.memory_space<vmem>>, vector<4x256xf32>,
    %54 = vector.extract_strided_slice %4 {offsets = [0, 64], sizes = [4, 256], strides = [1, 1]} : vector<4x324xf32> to vector<4x256xf32>
    %c80 = arith.constant 80 : index
    %c0_29 = arith.constant 0 : index
    %55 = vector.load %arg9[%c80, %c0_29] : memref<100x256xf32, #tpu.memory_space<vmem>>, vector<4x256xf32>
    tpu.vector_store %arg9[%c80, %c0_29], %54 {strides = array<i32>} : memref<100x256xf32, #tpu.memory_space<vmem>>, vector<4x256xf32>,
    %56 = vector.extract_strided_slice %7 {offsets = [0, 65], sizes = [4, 256], strides = [1, 1]} : vector<4x324xf32> to vector<4x256xf32>
    %c84 = arith.constant 84 : index
    %c0_30 = arith.constant 0 : index
    %57 = vector.load %arg9[%c84, %c0_30] : memref<100x256xf32, #tpu.memory_space<vmem>>, vector<4x256xf32>
    tpu.vector_store %arg9[%c84, %c0_30], %56 {strides = array<i32>} : memref<100x256xf32, #tpu.memory_space<vmem>>, vector<4x256xf32>,
    %58 = vector.extract_strided_slice %1 {offsets = [0, 66], sizes = [4, 256], strides = [1, 1]} : vector<4x324xf32> to vector<4x256xf32>
    %c88 = arith.constant 88 : index
    %c0_31 = arith.constant 0 : index
    %59 = vector.load %arg9[%c88, %c0_31] : memref<100x256xf32, #tpu.memory_space<vmem>>, vector<4x256xf32>
    tpu.vector_store %arg9[%c88, %c0_31], %58 {strides = array<i32>} : memref<100x256xf32, #tpu.memory_space<vmem>>, vector<4x256xf32>,
    %60 = vector.extract_strided_slice %10 {offsets = [0, 67], sizes = [4, 256], strides = [1, 1]} : vector<4x324xf32> to vector<4x256xf32>
    %c92 = arith.constant 92 : index
    %c0_32 = arith.constant 0 : index
    %61 = vector.load %arg9[%c92, %c0_32] : memref<100x256xf32, #tpu.memory_space<vmem>>, vector<4x256xf32>
    tpu.vector_store %arg9[%c92, %c0_32], %60 {strides = array<i32>} : memref<100x256xf32, #tpu.memory_space<vmem>>, vector<4x256xf32>,
    %62 = vector.extract_strided_slice %13 {offsets = [0, 68], sizes = [4, 256], strides = [1, 1]} : vector<4x324xf32> to vector<4x256xf32>
    %c96 = arith.constant 96 : index
    %c0_33 = arith.constant 0 : index
    %63 = vector.load %arg9[%c96, %c0_33] : memref<100x256xf32, #tpu.memory_space<vmem>>, vector<4x256xf32>
    tpu.vector_store %arg9[%c96, %c0_33], %62 {strides = array<i32>} : memref<100x256xf32, #tpu.memory_space<vmem>>, vector<4x256xf32>,
    %c0_34 = arith.constant 0 : index
    %c0_35 = arith.constant 0 : index
    %64 = vector.load %arg4[%c0_34, %c0_35] : memref<4x100xf32, #tpu.memory_space<vmem>>, vector<4x100xf32>
    %c0_36 = arith.constant 0 : index
    %c0_37 = arith.constant 0 : index
    %65 = vector.load %arg9[%c0_36, %c0_37] : memref<100x256xf32, #tpu.memory_space<vmem>>, vector<100x256xf32>
    %cst = arith.constant dense<0.000000e+00> : vector<4x256xf32>
    %66 = tpu.matmul %64, %65, %cst {dimension_numbers = #tpu.dot_dimension_numbers<[1], [0], [0], [1], [0, 0, 1, 1], [], []>} : vector<4x100xf32>, vector<100x256xf32>, vector<4x256xf32> -> vector<4x256xf32>
    %c0_38 = arith.constant 0 : index
    %c0_39 = arith.constant 0 : index
    %67 = vector.load %arg5[%c0_38, %c0_39] : memref<4x1xf32, #tpu.memory_space<vmem>>, vector<4x1xf32>
    %68 = vector.broadcast %67 : vector<4x1xf32> to vector<4x256xf32>
    %69 = arith.addf %66, %68 : vector<4x256xf32>
    %cst_40 = arith.constant 0.000000e+00 : f32
    %70 = vector.broadcast %cst_40 : f32 to vector<4x17xf32>
    %71 = tpu.concatenate %70, %69, %70 in 1 : vector<4x17xf32>, vector<4x256xf32>, vector<4x17xf32> -> vector<4x290xf32>
    %c0_41 = arith.constant 0 : index
    %c0_42 = arith.constant 0 : index
    %72 = vector.load %arg3[%c0_41, %c0_42] : memref<3x290xf32, #tpu.memory_space<vmem>>, vector<1x290xf32>
    %73 = vector.broadcast %72 : vector<1x290xf32> to vector<4x290xf32>
    %74 = arith.mulf %71, %73 : vector<4x290xf32>
    %c2 = arith.constant 2 : index
    %c0_43 = arith.constant 0 : index
    %75 = vector.load %arg3[%c2, %c0_43] : memref<3x290xf32, #tpu.memory_space<vmem>>, vector<1x290xf32>
    %76 = vector.broadcast %75 : vector<1x290xf32> to vector<4x290xf32>
    %77 = arith.mulf %71, %76 : vector<4x290xf32>
    %78 = vector.extract_strided_slice %74 {offsets = [0, 0], sizes = [4, 256], strides = [1, 1]} : vector<4x290xf32> to vector<4x256xf32>
    %c0_44 = arith.constant 0 : index
    %c0_45 = arith.constant 0 : index
    %79 = vector.load %arg10[%c0_44, %c0_45] : memref<36x256xf32, #tpu.memory_space<vmem>>, vector<4x256xf32>
    tpu.vector_store %arg10[%c0_44, %c0_45], %78 {strides = array<i32>} : memref<36x256xf32, #tpu.memory_space<vmem>>, vector<4x256xf32>,
    %80 = vector.extract_strided_slice %71 {offsets = [0, 1], sizes = [4, 256], strides = [1, 1]} : vector<4x290xf32> to vector<4x256xf32>
    %c4_46 = arith.constant 4 : index
    %c0_47 = arith.constant 0 : index
    %81 = vector.load %arg10[%c4_46, %c0_47] : memref<36x256xf32, #tpu.memory_space<vmem>>, vector<4x256xf32>
    tpu.vector_store %arg10[%c4_46, %c0_47], %80 {strides = array<i32>} : memref<36x256xf32, #tpu.memory_space<vmem>>, vector<4x256xf32>,
    %82 = vector.extract_strided_slice %77 {offsets = [0, 2], sizes = [4, 256], strides = [1, 1]} : vector<4x290xf32> to vector<4x256xf32>
    %c8_48 = arith.constant 8 : index
    %c0_49 = arith.constant 0 : index
    %83 = vector.load %arg10[%c8_48, %c0_49] : memref<36x256xf32, #tpu.memory_space<vmem>>, vector<4x256xf32>
    tpu.vector_store %arg10[%c8_48, %c0_49], %82 {strides = array<i32>} : memref<36x256xf32, #tpu.memory_space<vmem>>, vector<4x256xf32>,
    %84 = vector.extract_strided_slice %74 {offsets = [0, 16], sizes = [4, 256], strides = [1, 1]} : vector<4x290xf32> to vector<4x256xf32>
    %c12_50 = arith.constant 12 : index
    %c0_51 = arith.constant 0 : index
    %85 = vector.load %arg10[%c12_50, %c0_51] : memref<36x256xf32, #tpu.memory_space<vmem>>, vector<4x256xf32>
    tpu.vector_store %arg10[%c12_50, %c0_51], %84 {strides = array<i32>} : memref<36x256xf32, #tpu.memory_space<vmem>>, vector<4x256xf32>,
    %86 = vector.extract_strided_slice %71 {offsets = [0, 17], sizes = [4, 256], strides = [1, 1]} : vector<4x290xf32> to vector<4x256xf32>
    %c16_52 = arith.constant 16 : index
    %c0_53 = arith.constant 0 : index
    %87 = vector.load %arg10[%c16_52, %c0_53] : memref<36x256xf32, #tpu.memory_space<vmem>>, vector<4x256xf32>
    tpu.vector_store %arg10[%c16_52, %c0_53], %86 {strides = array<i32>} : memref<36x256xf32, #tpu.memory_space<vmem>>, vector<4x256xf32>,
    %88 = vector.extract_strided_slice %77 {offsets = [0, 18], sizes = [4, 256], strides = [1, 1]} : vector<4x290xf32> to vector<4x256xf32>
    %c20_54 = arith.constant 20 : index
    %c0_55 = arith.constant 0 : index
    %89 = vector.load %arg10[%c20_54, %c0_55] : memref<36x256xf32, #tpu.memory_space<vmem>>, vector<4x256xf32>
    tpu.vector_store %arg10[%c20_54, %c0_55], %88 {strides = array<i32>} : memref<36x256xf32, #tpu.memory_space<vmem>>, vector<4x256xf32>,
    %90 = vector.extract_strided_slice %74 {offsets = [0, 32], sizes = [4, 256], strides = [1, 1]} : vector<4x290xf32> to vector<4x256xf32>
    %c24_56 = arith.constant 24 : index
    %c0_57 = arith.constant 0 : index
    %91 = vector.load %arg10[%c24_56, %c0_57] : memref<36x256xf32, #tpu.memory_space<vmem>>, vector<4x256xf32>
    tpu.vector_store %arg10[%c24_56, %c0_57], %90 {strides = array<i32>} : memref<36x256xf32, #tpu.memory_space<vmem>>, vector<4x256xf32>,
    %92 = vector.extract_strided_slice %71 {offsets = [0, 33], sizes = [4, 256], strides = [1, 1]} : vector<4x290xf32> to vector<4x256xf32>
    %c28_58 = arith.constant 28 : index
    %c0_59 = arith.constant 0 : index
    %93 = vector.load %arg10[%c28_58, %c0_59] : memref<36x256xf32, #tpu.memory_space<vmem>>, vector<4x256xf32>
    tpu.vector_store %arg10[%c28_58, %c0_59], %92 {strides = array<i32>} : memref<36x256xf32, #tpu.memory_space<vmem>>, vector<4x256xf32>,
    %94 = vector.extract_strided_slice %77 {offsets = [0, 34], sizes = [4, 256], strides = [1, 1]} : vector<4x290xf32> to vector<4x256xf32>
    %c32_60 = arith.constant 32 : index
    %c0_61 = arith.constant 0 : index
    %95 = vector.load %arg10[%c32_60, %c0_61] : memref<36x256xf32, #tpu.memory_space<vmem>>, vector<4x256xf32>
    tpu.vector_store %arg10[%c32_60, %c0_61], %94 {strides = array<i32>} : memref<36x256xf32, #tpu.memory_space<vmem>>, vector<4x256xf32>,
    %c0_62 = arith.constant 0 : index
    %c0_63 = arith.constant 0 : index
    %96 = vector.load %arg6[%c0_62, %c0_63] : memref<8x36xf32, #tpu.memory_space<vmem>>, vector<8x36xf32>
    %c0_64 = arith.constant 0 : index
    %c0_65 = arith.constant 0 : index
    %97 = vector.load %arg10[%c0_64, %c0_65] : memref<36x256xf32, #tpu.memory_space<vmem>>, vector<36x256xf32>
    %cst_66 = arith.constant dense<0.000000e+00> : vector<8x256xf32>
    %98 = tpu.matmul %96, %97, %cst_66 {dimension_numbers = #tpu.dot_dimension_numbers<[1], [0], [0], [1], [0, 0, 1, 1], [], []>} : vector<8x36xf32>, vector<36x256xf32>, vector<8x256xf32> -> vector<8x256xf32>
    %c0_67 = arith.constant 0 : index
    %c0_68 = arith.constant 0 : index
    %99 = vector.load %arg7[%c0_67, %c0_68] : memref<8x1xf32, #tpu.memory_space<vmem>>, vector<8x1xf32>
    %100 = vector.broadcast %99 : vector<8x1xf32> to vector<8x256xf32>
    %101 = arith.addf %98, %100 : vector<8x256xf32>
    %102 = math.tanh %101 : vector<8x256xf32>
    %c0_69 = arith.constant 0 : index
    %c0_70 = arith.constant 0 : index
    %c0_71 = arith.constant 0 : index
    %103 = vector.load %arg8[%c0_69, %c0_70, %c0_71] : memref<1x8x256xf32, #tpu.memory_space<vmem>>, vector<1x8x256xf32>
    %104 = vector.shape_cast %103 : vector<1x8x256xf32> to vector<8x256xf32>
    %105 = vector.shape_cast %102 : vector<8x256xf32> to vector<1x8x256xf32>
    tpu.vector_store %arg8[%c0_69, %c0_70, %c0_71], %105 {strides = array<i32>} : memref<1x8x256xf32, #tpu.memory_space<vmem>>, vector<1x8x256xf32>,
    return
  }
  func.func @transform_0(%arg0: i32) -> (i32, i32, i32) {
    %c0_i32 = arith.constant 0 : i32
    %c0_i32_0 = arith.constant 0 : i32
    %c0_i32_1 = arith.constant 0 : i32
    return %arg0, %c0_i32, %c0_i32_0 : i32, i32, i32
  }
  func.func @transform_1(%arg0: i32) -> (i32, i32) {
    %c0_i32 = arith.constant 0 : i32
    %c0_i32_0 = arith.constant 0 : i32
    %c0_i32_1 = arith.constant 0 : i32
    return %c0_i32, %c0_i32_0 : i32, i32
  }
  func.func @transform_2(%arg0: i32) -> (i32, i32) {
    %c0_i32 = arith.constant 0 : i32
    %c0_i32_0 = arith.constant 0 : i32
    %c0_i32_1 = arith.constant 0 : i32
    return %c0_i32, %c0_i32_0 : i32, i32
  }
  func.func @transform_3(%arg0: i32) -> (i32, i32) {
    %c0_i32 = arith.constant 0 : i32
    %c0_i32_0 = arith.constant 0 : i32
    %c0_i32_1 = arith.constant 0 : i32
    return %c0_i32, %c0_i32_0 : i32, i32
  }
  func.func @transform_4(%arg0: i32) -> (i32, i32) {
    %c0_i32 = arith.constant 0 : i32
    %c0_i32_0 = arith.constant 0 : i32
    %c0_i32_1 = arith.constant 0 : i32
    return %c0_i32, %c0_i32_0 : i32, i32
  }
  func.func @transform_5(%arg0: i32) -> (i32, i32) {
    %c0_i32 = arith.constant 0 : i32
    %c0_i32_0 = arith.constant 0 : i32
    %c0_i32_1 = arith.constant 0 : i32
    return %c0_i32, %c0_i32_0 : i32, i32
  }
  func.func @transform_6(%arg0: i32) -> (i32, i32) {
    %c0_i32 = arith.constant 0 : i32
    %c0_i32_0 = arith.constant 0 : i32
    %c0_i32_1 = arith.constant 0 : i32
    return %c0_i32, %c0_i32_0 : i32, i32
  }
  func.func @transform_7(%arg0: i32) -> (i32, i32, i32) {
    %c0_i32 = arith.constant 0 : i32
    %c0_i32_0 = arith.constant 0 : i32
    %c0_i32_1 = arith.constant 0 : i32
    return %arg0, %c0_i32, %c0_i32_0 : i32, i32, i32
  }
}

</mosaic_0001>

<bundles_post_ra>
// kernel: highway_output_2d.1
= control target key start
LH: loop header
LB: loop body
LE: loop exit
PB: predicated region body
PF: predicated region fallthrough
CT: control target
= control target key end

     0   :  { %s1312_s24 = smov 0   ;;  %s1564_s0 = inlined_call_operand.vmem [shape: f32[2,4,324], index: 0, kind: input, shape index: {}]   ;;  %s1565_s1 = inlined_call_operand.vmem [shape: f32[5,324], index: 1, kind: input, shape index: {}]   ;;  %s1566_s2 = inlined_call_operand.vmem [shape: f32[3,290], index: 2, kind: input, shape index: {}]   ;;  %s1567_s3 = inlined_call_operand.vmem [shape: f32[4,100], index: 3, kind: input, shape index: {}]   ;;  %s1568_s4 = inlined_call_operand.vmem [shape: f32[4,1], index: 4, kind: input, shape index: {}]   ;;  %s1569_s5 = inlined_call_operand.vmem [shape: f32[8,36], index: 5, kind: input, shape index: {}]   ;;  %s1570_s6 = inlined_call_operand.vmem [shape: f32[8,1], index: 6, kind: input, shape index: {}]   ;;  %s1571_s7 = inlined_call_operand.vmem [shape: f32[2,8,256], index: 7, kind: output, shape index: {}]  }
   0x1 LB: > { %s1174_s25 = sadd.s32 4294967295, %s1244_s24   ;;  %p1178_p0 = scmp.ge.s32.totalorder %s1244_s24, 1  ;;  %s1244_s24 = sphi %s1312_s24, %s17_s24  }
   0x2   : > { %p237_p1 = scmp.lt.s32.totalorder %s1244_s24, 3 }
   0x4   : > { %p238_p2 = pnand %p1178_p0, %p237_p1 }
   0x5   : > { %p269_p3 = scmp.lt.s32.totalorder (!%p238_p2), %s1174_s25, 1  ;;  %s1246_s15 = smov (!%p238_p2), 124  }
   0x6   : > { %241 = sbr.rel (%p238_p2) target bundleno = 943 (0x3af), region = 48  ;;  %s1247_s16 = smov (!%p238_p2), 112  }
   0x7   : > { %s1248_s17 = smov (!%p238_p2), 111   ;;  %s1249_s18 = smov (!%p238_p2), 110  }
   0x8   : > { %s1250_s19 = smov (!%p238_p2), 109   ;;  %s1251_s20 = smov (!%p238_p2), 108  }
   0x9   : > { %s1252_s21 = smov (!%p238_p2), 96   ;;  %s1253_s22 = smov (!%p238_p2), 95  }
   0xa   : > { %s1254_s23 = smov (!%p238_p2), 94   ;;  %s1255_s26 = smov (!%p238_p2), 93  }
   0xb   : > { %v281_v0 = vld [vmem:[%s1565_s1] ss:$8 sm:$0x7]  ;;  %s1573_s25 = smov (!%p269_p3, %s1174_s25), 1  ;;  %vm288_vm0 = vcmask 1043456   ;;  %s1256_s27 = smov 92  }
   0xc   : > { %v283_v1 = vperm.slane %v281_v0, 0  ;;  %v284_v2 = vperm.slane %v281_v0, 1  ;;  %v1182_v3 = vld [vmem:[%s1565_s1 + $0x1] ss:$8 sm:$0x7]  ;;  %s1197_s30 = smul.u32 12, %s1573_s25 }
   0xd   : > { %v297_v5 = vperm.slane %v1182_v3, 1  ;;  %v298_v7 = vperm.slane %v1182_v3, 2  ;;  %v296_v9 = vperm.slane %v1182_v3, 0  ;;  %v1183_v16 = vld [vmem:[%s1565_s1 + $0x3] ss:$8 sm:$0x7] }
   0xe   : > { %v287_v4 = vrot.slane %v284_v2, 4  ;;  %s273_s10 = scalar_lea.vmem %s1564_s0, %s1197_s30  ;;  %v309_v20 = vperm.slane %v1183_v16, 1  ;;  %v310_v21 = vperm.slane %v1183_v16, 2  ;;  %v308_v22 = vperm.slane %v1183_v16, 0  ;;  %s1257_s28 = smov 80  }
   0xf   : > { %v1333_v8 = vld [vmem:[%s273_s10] sm:$0xff]  ;;  %v300_v10 = vrot.slane %v297_v5, 4  ;;  %v1335_v11 = vld [vmem:[%s273_s10 + $0x8] sm:$0xf]  ;;  %v285_v40 = vperm.slane %v281_v0, 2  ;;  %s1258_s29 = smov 79  }
  0x10   : > { %v289_v6 = vsel %vm288_vm0, %v283_v1, %v287_v4  ;;  %v1341_v13 = vmul.f32 %v298_v7, %v1335_v11  ;;  %v312_v23 = vrot.slane %v309_v20, 4  ;;  %v1361_v26 = vmul.f32 %v310_v21, %v1335_v11  ;;  %v1184_v27 = vld [vmem:[%s1565_s1 + $0x4] ss:$8 sm:$0x7]  ;;  %s1259_s30 = smov 78   ;;  %s1260_s8 = smov 77  }
  0x11   : > { %v1338_v12 = vmul.f32 %v289_v6, %v1333_v8  ;;  %v301_v14 = vsel %vm288_vm0, %v296_v9, %v300_v10  ;;  %v321_v29 = vperm.slane %v1184_v27, 1  ;;  %v322_v31 = vperm.slane %v1184_v27, 2  ;;  %s1261_s9 = smov 76   ;;  %s1262_s10 = smov 64  }
  0x12   : > { %342 = vst [vmem:[#allocation1 + $0x11] ss:$2 sm:$0xff] %v1341_v13  ;;  %v1347_v15 = vmul.f32 %v301_v14, %v1333_v8  ;;  %v313_v28 = vsel %vm288_vm0, %v308_v22, %v312_v23  ;;  %v320_v33 = vperm.slane %v1184_v27, 0  ;;  %v1394_v44 = vmul.f32 %v285_v40, %v1335_v11  ;;  %s1263_s11 = smov 63   ;;  %s1264_s12 = smov 62  }
  0x13   : > { %330 = vst [vmem:[#allocation1] ss:$2 sm:$0xff] %v1338_v12  ;;  %v1372_v32 = vmul.f32 %v313_v28, %v1333_v8  ;;  %v324_v34 = vrot.slane %v321_v29, 4  ;;  %v1379_v37 = vmul.f32 %v322_v31, %v1335_v11  ;;  %vm416_vm1 = vcmask 1014784   ;;  %s1265_s13 = smov 61   ;;  %s1266_s14 = smov 60  }
  0x14   : > { %vm437_vm2 = vcmask 916480   ;;  %vm456_vm3 = vcmask 908288   ;;  %vm476_vm4 = vcmask 900096   ;;  %vm495_vm5 = vcmask 891904  }
  0x15   : > { %v325_v38 = vsel %vm288_vm0, %v320_v33, %v324_v34  ;;  %vm515_vm6 = vcmask 883712   ;;  %vm534_vm7 = vcmask 785408   ;;  %vm554_vm8 = vcmask 777216  }
  0x16   : > { %v1387_v41 = vmul.f32 %v325_v38, %v1333_v8  ;;  %vm573_vm9 = vcmask 769024   ;;  %vm593_vm10 = vcmask 760832   ;;  %vm612_vm11 = vcmask 752640  }
  0x17   : > { %vm632_vm12 = vcmask 654336   ;;  %vm651_vm13 = vcmask 646144   ;;  %vm671_vm14 = vcmask 637952   ;;  %vm690_vm15 = vcmask 629760  }
  0x19   : > { %v1353_v19 = vld.sshfl [vmem:[#allocation1 + $0x10] sm:$0xff pattern:$0x75316420] }
  0x1a   : > { %v331_v17 = vld.sshfl [vmem:[#allocation1] sm:$0xff pattern:$0x75316420]  ;;  %v332_v18 = vld.sshfl [vmem:[#allocation1 + $0x8] sm:$0xff pattern:$0x75316420] }
  0x1b   : > { %340 = vst [vmem:[#allocation1 + $0x1] ss:$2 sm:$0xff] %v1347_v15 }
  0x1c   : > { %335 = vst [vmem:[#allocation2 + $0xb0] sm:$0xf] %v331_v17 }
  0x1d   : > { %336 = vst [vmem:[#allocation2] sm:$0xf] %v332_v18 }
  0x1e   : > { %363 = vst [vmem:[#allocation1 + $0x10] ss:$2 sm:$0xff] %v1335_v11 }
  0x22   : > { %v1356_v24 = vld.sshfl [vmem:[#allocation1] sm:$0xff pattern:$0x75316420]  ;;  %v1358_v25 = vld.sshfl [vmem:[#allocation1 + $0x8] sm:$0xff pattern:$0x75316420] }
  0x23   : > { %361 = vst [vmem:[#allocation1] ss:$2 sm:$0xff] %v1333_v8 }
  0x25   : > { %v1368_v30 = vld.sshfl [vmem:[#allocation1 + $0x10] sm:$0xff pattern:$0x75316420] }
  0x26   : > { %385 = vst [vmem:[#allocation1 + $0x11] ss:$2 sm:$0xff] %v1361_v26 }
  0x2a   : > { %v1374_v35 = vld.sshfl [vmem:[#allocation1] sm:$0xff pattern:$0x75316420]  ;;  %v1376_v36 = vld.sshfl [vmem:[#allocation1 + $0x8] sm:$0xff pattern:$0x75316420] }
  0x2b   : > { %383 = vst [vmem:[#allocation1 + $0x1] ss:$2 sm:$0xff] %v1372_v32 }
  0x2d   : > { %v1383_v39 = vld.sshfl [vmem:[#allocation1 + $0x10] sm:$0xff pattern:$0x75316420] }
  0x2e   : > { %406 = vst [vmem:[#allocation1 + $0x10] ss:$2 sm:$0xff] %v1379_v37 }
  0x32   : > { %v1389_v42 = vld.sshfl [vmem:[#allocation1] sm:$0xff pattern:$0x75316420]  ;;  %v1391_v43 = vld.sshfl [vmem:[#allocation1 + $0x8] sm:$0xff pattern:$0x75316420] }
  0x33   : > { %404 = vst [vmem:[#allocation1] ss:$2 sm:$0xff] %v1387_v41 }
  0x35   : > { %v409_v45 = vld.sshfl [vmem:[#allocation1 + $0x10] sm:$0xff pattern:$0x75316420] }
  0x36   : > { %414 = vrot.lane.b32.xlu2 %v409_v45, %s1246_s15  ;;  %427 = vst [vmem:[#allocation1 + $0x11] ss:$2 sm:$0xff] %v1394_v44 }
  0x3a   : > { %v408_v46 = vld.sshfl [vmem:[#allocation1 + $0x8] sm:$0xff pattern:$0x75316420]  ;;  %v407_v47 = vld.sshfl [vmem:[#allocation1] sm:$0xff pattern:$0x75316420] }
  0x3b   : > { %412 = vrot.lane.b32.xlu1 %v408_v46, %s1246_s15  ;;  %410 = vrot.lane.b32.xlu0 %v407_v47, %s1246_s15  ;;  %425 = vst [vmem:[#allocation1 + $0x1] ss:$2 sm:$0xff] %v1338_v12  ;;  %s1267_s15 = smov 126  }
  0x3d   : > { %v430_v48 = vld.sshfl [vmem:[#allocation1 + $0x10] sm:$0xff pattern:$0x75316420] }
  0x3e   : > { %435 = vrot.lane.b32.xlu2 %v430_v48, %s1247_s16  ;;  %446 = vst [vmem:[#allocation1 + $0x10] ss:$2 sm:$0xff] %v1341_v13 }
  0x42   : > { %v429_v49 = vld.sshfl [vmem:[#allocation1 + $0x8] sm:$0xff pattern:$0x75316420]  ;;  %v428_v50 = vld.sshfl [vmem:[#allocation1] sm:$0xff pattern:$0x75316420] }
  0x43   : > { %433 = vrot.lane.b32.xlu1 %v429_v49, %s1247_s16  ;;  %431 = vrot.lane.b32.xlu0 %v428_v50, %s1247_s16  ;;  %444 = vst [vmem:[#allocation1] ss:$2 sm:$0xff] %v1347_v15 }
  0x45   : > { %v449_v51 = vld.sshfl [vmem:[#allocation1 + $0x10] sm:$0xff pattern:$0x75316420] }
  0x46   : > { %454 = vrot.lane.b32.xlu2 %v449_v51, %s1248_s17  ;;  %466 = vst [vmem:[#allocation1 + $0x11] ss:$2 sm:$0xff] %v1335_v11 }
  0x4a   : > { %v448_v52 = vld.sshfl [vmem:[#allocation1 + $0x8] sm:$0xff pattern:$0x75316420]  ;;  %v447_v53 = vld.sshfl [vmem:[#allocation1] sm:$0xff pattern:$0x75316420] }
  0x4b   : > { %452 = vrot.lane.b32.xlu1 %v448_v52, %s1248_s17  ;;  %450 = vrot.lane.b32.xlu0 %v447_v53, %s1248_s17  ;;  %464 = vst [vmem:[#allocation1 + $0x1] ss:$2 sm:$0xff] %v1333_v8 }
  0x4d   : > { %v469_v54 = vld.sshfl [vmem:[#allocation1 + $0x10] sm:$0xff pattern:$0x75316420] }
  0x4e   : > { %474 = vrot.lane.b32.xlu2 %v469_v54, %s1249_s18  ;;  %485 = vst [vmem:[#allocation1 + $0x10] ss:$2 sm:$0xff] %v1361_v26 }
  0x52   : > { %v468_v55 = vld.sshfl [vmem:[#allocation1 + $0x8] sm:$0xff pattern:$0x75316420]  ;;  %v467_v56 = vld.sshfl [vmem:[#allocation1] sm:$0xff pattern:$0x75316420] }
  0x53   : > { %472 = vrot.lane.b32.xlu1 %v468_v55, %s1249_s18  ;;  %470 = vrot.lane.b32.xlu0 %v467_v56, %s1249_s18  ;;  %483 = vst [vmem:[#allocation1] ss:$2 sm:$0xff] %v1372_v32 }
  0x55   : > { %v488_v57 = vld.sshfl [vmem:[#allocation1 + $0x10] sm:$0xff pattern:$0x75316420] }
  0x56   : > { %493 = vrot.lane.b32.xlu2 %v488_v57, %s1250_s19  ;;  %505 = vst [vmem:[#allocation1 + $0x11] ss:$2 sm:$0xff] %v1379_v37 }
  0x5a   : > { %v487_v58 = vld.sshfl [vmem:[#allocation1 + $0x8] sm:$0xff pattern:$0x75316420]  ;;  %v486_v59 = vld.sshfl [vmem:[#allocation1] sm:$0xff pattern:$0x75316420] }
  0x5b   : > { %491 = vrot.lane.b32.xlu1 %v487_v58, %s1250_s19  ;;  %489 = vrot.lane.b32.xlu0 %v486_v59, %s1250_s19  ;;  %503 = vst [vmem:[#allocation1 + $0x1] ss:$2 sm:$0xff] %v1387_v41  ;;  %s1268_s19 = smov 125  }
  0x5d   : > { %v508_v60 = vld.sshfl [vmem:[#allocation1 + $0x10] sm:$0xff pattern:$0x75316420] }
  0x5e   : > { %513 = vrot.lane.b32.xlu2 %v508_v60, %s1251_s20  ;;  %524 = vst [vmem:[#allocation1 + $0x10] ss:$2 sm:$0xff] %v1394_v44 }
  0x62   : > { %v507_v61 = vld.sshfl [vmem:[#allocation1 + $0x8] sm:$0xff pattern:$0x75316420]  ;;  %v506_v62 = vld.sshfl [vmem:[#allocation1] sm:$0xff pattern:$0x75316420] }
  0x63   : > { %511 = vrot.lane.b32.xlu1 %v507_v61, %s1251_s20  ;;  %509 = vrot.lane.b32.xlu0 %v506_v62, %s1251_s20  ;;  %522 = vst [vmem:[#allocation1] ss:$2 sm:$0xff] %v1338_v12  ;;  %s1269_s20 = smov 127  }
  0x65   : > { %v527_v63 = vld.sshfl [vmem:[#allocation1 + $0x10] sm:$0xff pattern:$0x75316420] }
  0x66   : > { %532 = vrot.lane.b32.xlu2 %v527_v63, %s1252_s21  ;;  %544 = vst [vmem:[#allocation1 + $0x11] ss:$2 sm:$0xff] %v1341_v13 }
  0x6a   : > { %v526_v0 = vld.sshfl [vmem:[#allocation1 + $0x8] sm:$0xff pattern:$0x75316420]  ;;  %v525_v1 = vld.sshfl [vmem:[#allocation1] sm:$0xff pattern:$0x75316420] }
  0x6b   : > { %530 = vrot.lane.b32.xlu1 %v526_v0, %s1252_s21  ;;  %528 = vrot.lane.b32.xlu0 %v525_v1, %s1252_s21  ;;  %542 = vst [vmem:[#allocation1 + $0x1] ss:$2 sm:$0xff] %v1347_v15 }
  0x6d   : > { %v547_v2 = vld.sshfl [vmem:[#allocation1 + $0x10] sm:$0xff pattern:$0x75316420] }
  0x6e   : > { %552 = vrot.lane.b32.xlu2 %v547_v2, %s1253_s22  ;;  %563 = vst [vmem:[#allocation1 + $0x10] ss:$2 sm:$0xff] %v1335_v11 }
  0x72   : > { %v546_v3 = vld.sshfl [vmem:[#allocation1 + $0x8] sm:$0xff pattern:$0x75316420]  ;;  %v545_v4 = vld.sshfl [vmem:[#allocation1] sm:$0xff pattern:$0x75316420] }
  0x73   : > { %550 = vrot.lane.b32.xlu1 %v546_v3, %s1253_s22  ;;  %548 = vrot.lane.b32.xlu0 %v545_v4, %s1253_s22  ;;  %561 = vst [vmem:[#allocation1] ss:$2 sm:$0xff] %v1333_v8 }
  0x75   : > { %v566_v5 = vld.sshfl [vmem:[#allocation1 + $0x10] sm:$0xff pattern:$0x75316420] }
  0x76   : > { %571 = vrot.lane.b32.xlu2 %v566_v5, %s1254_s23  ;;  %583 = vst [vmem:[#allocation1 + $0x11] ss:$2 sm:$0xff] %v1361_v26 }
  0x7a   : > { %v565_v6 = vld.sshfl [vmem:[#allocation1 + $0x8] sm:$0xff pattern:$0x75316420]  ;;  %v564_v7 = vld.sshfl [vmem:[#allocation1] sm:$0xff pattern:$0x75316420] }
  0x7b   : > { %569 = vrot.lane.b32.xlu1 %v565_v6, %s1254_s23  ;;  %567 = vrot.lane.b32.xlu0 %v564_v7, %s1254_s23  ;;  %581 = vst [vmem:[#allocation1 + $0x1] ss:$2 sm:$0xff] %v1372_v32 }
  0x7d   : > { %v586_v9 = vld.sshfl [vmem:[#allocation1 + $0x10] sm:$0xff pattern:$0x75316420] }
  0x7e   : > { %591 = vrot.lane.b32.xlu2 %v586_v9, %s1255_s26  ;;  %602 = vst [vmem:[#allocation1 + $0x10] ss:$2 sm:$0xff] %v1379_v37 }
  0x82   : > { %v585_v10 = vld.sshfl [vmem:[#allocation1 + $0x8] sm:$0xff pattern:$0x75316420]  ;;  %v584_v14 = vld.sshfl [vmem:[#allocation1] sm:$0xff pattern:$0x75316420] }
  0x83   : > { %589 = vrot.lane.b32.xlu1 %v585_v10, %s1255_s26  ;;  %587 = vrot.lane.b32.xlu0 %v584_v14, %s1255_s26  ;;  %600 = vst [vmem:[#allocation1] ss:$2 sm:$0xff] %v1387_v41 }
  0x85   : > { %v605_v16 = vld.sshfl [vmem:[#allocation1 + $0x10] sm:$0xff pattern:$0x75316420] }
  0x86   : > { %610 = vrot.lane.b32.xlu2 %v605_v16, %s1256_s27  ;;  %622 = vst [vmem:[#allocation1 + $0x11] ss:$2 sm:$0xff] %v1394_v44 }
  0x8a   : > { %v604_v17 = vld.sshfl [vmem:[#allocation1 + $0x8] sm:$0xff pattern:$0x75316420]  ;;  %v603_v18 = vld.sshfl [vmem:[#allocation1] sm:$0xff pattern:$0x75316420] }
  0x8b   : > { %608 = vrot.lane.b32.xlu1 %v604_v17, %s1256_s27  ;;  %606 = vrot.lane.b32.xlu0 %v603_v18, %s1256_s27  ;;  %620 = vst [vmem:[#allocation1 + $0x1] ss:$2 sm:$0xff] %v1338_v12 }
  0x8d   : > { %v625_v20 = vld.sshfl [vmem:[#allocation1 + $0x10] sm:$0xff pattern:$0x75316420] }
  0x8e   : > { %630 = vrot.lane.b32.xlu2 %v625_v20, %s1257_s28  ;;  %641 = vst [vmem:[#allocation1 + $0x10] ss:$2 sm:$0xff] %v1341_v13 }
  0x90   : > { %v415_v21 = vpop.permute.xlu2 %414 }
  0x92   : > { %v624_v22 = vld.sshfl [vmem:[#allocation1 + $0x8] sm:$0xff pattern:$0x75316420]  ;;  %v623_v23 = vld.sshfl [vmem:[#allocation1] sm:$0xff pattern:$0x75316420] }
  0x93   : > { %628 = vrot.lane.b32.xlu1 %v624_v22, %s1257_s28  ;;  %626 = vrot.lane.b32.xlu0 %v623_v23, %s1257_s28  ;;  %639 = vst [vmem:[#allocation1] ss:$2 sm:$0xff] %v1347_v15 }
  0x95   : > { %v644_v27 = vld.sshfl [vmem:[#allocation1 + $0x10] sm:$0xff pattern:$0x75316420] }
  0x96   : > { %649 = vrot.lane.b32.xlu2 %v644_v27, %s1258_s29  ;;  %661 = vst [vmem:[#allocation1 + $0x11] ss:$2 sm:$0xff] %v1335_v11 }
  0x98   : > { %v436_v28 = vpop.permute.xlu2 %435 }
  0x9a   : > { %v643_v29 = vld.sshfl [vmem:[#allocation1 + $0x8] sm:$0xff pattern:$0x75316420]  ;;  %v642_v31 = vld.sshfl [vmem:[#allocation1] sm:$0xff pattern:$0x75316420] }
  0x9b   : > { %647 = vrot.lane.b32.xlu1 %v643_v29, %s1258_s29  ;;  %645 = vrot.lane.b32.xlu0 %v642_v31, %s1258_s29  ;;  %659 = vst [vmem:[#allocation1 + $0x1] ss:$2 sm:$0xff] %v1333_v8 }
  0x9d   : > { %v664_v33 = vld.sshfl [vmem:[#allocation1 + $0x10] sm:$0xff pattern:$0x75316420] }
  0x9e   : > { %669 = vrot.lane.b32.xlu2 %v664_v33, %s1259_s30  ;;  %680 = vst [vmem:[#allocation1 + $0x10] ss:$2 sm:$0xff] %v1361_v26 }
  0xa0   : > { %v455_v34 = vpop.permute.xlu2 %454 }
  0xa2   : > { %v663_v38 = vld.sshfl [vmem:[#allocation1 + $0x8] sm:$0xff pattern:$0x75316420]  ;;  %v662_v40 = vld.sshfl [vmem:[#allocation1] sm:$0xff pattern:$0x75316420] }
  0xa3   : > { %667 = vrot.lane.b32.xlu1 %v663_v38, %s1259_s30  ;;  %665 = vrot.lane.b32.xlu0 %v662_v40, %s1259_s30  ;;  %678 = vst [vmem:[#allocation1] ss:$2 sm:$0xff] %v1372_v32  ;;  %s1271_s30 = smov 17  }
  0xa5   : > { %v683_v45 = vld.sshfl [vmem:[#allocation1 + $0x10] sm:$0xff pattern:$0x75316420] }
  0xa6   : > { %688 = vrot.lane.b32.xlu2 %v683_v45, %s1260_s8  ;;  %700 = vst [vmem:[#allocation1 + $0x11] ss:$2 sm:$0xff] %v1379_v37 }
  0xa8   : > { %v475_v46 = vpop.permute.xlu2 %474 }
  0xaa   : > { %v682_v47 = vld.sshfl [vmem:[#allocation1 + $0x8] sm:$0xff pattern:$0x75316420]  ;;  %v681_v48 = vld.sshfl [vmem:[#allocation1] sm:$0xff pattern:$0x75316420] }
  0xab   : > { %686 = vrot.lane.b32.xlu1 %v682_v47, %s1260_s8  ;;  %684 = vrot.lane.b32.xlu0 %v681_v48, %s1260_s8  ;;  %698 = vst [vmem:[#allocation1 + $0x1] ss:$2 sm:$0xff] %v1387_v41 }
  0xad   : > { %v413_v49 = vpop.permute.xlu1 %412  ;;  %v411_v50 = vpop.permute.xlu0 %410  ;;  %v703_v51 = vld.sshfl [vmem:[#allocation1 + $0x10] sm:$0xff pattern:$0x75316420] }
  0xae   : > { %v418_v52 = vsel %vm416_vm1, %v413_v49, %v415_v21  ;;  %v417_v53 = vsel %vm416_vm1, %v411_v50, %v413_v49  ;;  %708 = vrot.lane.b32.xlu2 %v703_v51, %s1261_s9  ;;  %719 = vst [vmem:[#allocation1 + $0x10] ss:$2 sm:$0xff] %v1394_v44  ;;  %vm710_vm1 = vcmask 621568  }
  0xaf   : > { %422 = vst [vmem:[#allocation2 + $0x28] sm:$0xf] %v418_v52 }
  0xb0   : > { %421 = vst [vmem:[#allocation2 + $0x60] sm:$0xf] %v417_v53  ;;  %v494_v54 = vpop.permute.xlu2 %493 }
  0xb2   : > { %v702_v55 = vld.sshfl [vmem:[#allocation1 + $0x8] sm:$0xff pattern:$0x75316420]  ;;  %v701_v56 = vld.sshfl [vmem:[#allocation1] sm:$0xff pattern:$0x75316420] }
  0xb3   : > { %706 = vrot.lane.b32.xlu1 %v702_v55, %s1261_s9  ;;  %704 = vrot.lane.b32.xlu0 %v701_v56, %s1261_s9  ;;  %717 = vst [vmem:[#allocation1] ss:$2 sm:$0xff] %v1338_v12 }
  0xb5   : > { %v434_v57 = vpop.permute.xlu1 %433  ;;  %v432_v58 = vpop.permute.xlu0 %431  ;;  %v722_v59 = vld.sshfl [vmem:[#allocation1 + $0x10] sm:$0xff pattern:$0x75316420] }
  0xb6   : > { %v439_v60 = vsel %vm437_vm2, %v434_v57, %v436_v28  ;;  %v438_v61 = vsel %vm437_vm2, %v432_v58, %v434_v57  ;;  %727 = vrot.lane.b32.xlu2 %v722_v59, %s1262_s10  ;;  %739 = vst [vmem:[#allocation1 + $0x11] ss:$2 sm:$0xff] %v1341_v13 }
  0xb7   : > { %443 = vst [vmem:[#allocation2 + $0x28] sm:$0xf0] %v439_v60 }
  0xb8   : > { %442 = vst [vmem:[#allocation2 + $0x60] sm:$0xf0] %v438_v61  ;;  %v514_v44 = vpop.permute.xlu2 %513 }
  0xba   : > { %v721_v62 = vld.sshfl [vmem:[#allocation1 + $0x8] sm:$0xff pattern:$0x75316420]  ;;  %v720_v63 = vld.sshfl [vmem:[#allocation1] sm:$0xff pattern:$0x75316420] }
  0xbb   : > { %725 = vrot.lane.b32.xlu1 %v721_v62, %s1262_s10  ;;  %723 = vrot.lane.b32.xlu0 %v720_v63, %s1262_s10  ;;  %737 = vst [vmem:[#allocation1 + $0x1] ss:$2 sm:$0xff] %v1347_v15 }
  0xbd   : > { %v453_v12 = vpop.permute.xlu1 %452  ;;  %v451_v0 = vpop.permute.xlu0 %450  ;;  %v742_v1 = vld.sshfl [vmem:[#allocation1 + $0x10] sm:$0xff pattern:$0x75316420] }
  0xbe   : > { %v458_v2 = vsel %vm456_vm3, %v453_v12, %v455_v34  ;;  %v457_v3 = vsel %vm456_vm3, %v451_v0, %v453_v12  ;;  %758 = vst [vmem:[#allocation1 + $0x10] ss:$2 sm:$0xff] %v1335_v11  ;;  %747 = vrot.lane.b32.xlu2 %v742_v1, %s1263_s11 }
  0xbf   : > { %462 = vst [vmem:[#allocation2 + $0x78] sm:$0xf] %v458_v2 }
  0xc0   : > { %461 = vst [vmem:[#allocation2 + $0x40] sm:$0xf] %v457_v3  ;;  %v533_v13 = vpop.permute.xlu2 %532 }
  0xc2   : > { %v741_v4 = vld.sshfl [vmem:[#allocation1 + $0x8] sm:$0xff pattern:$0x75316420]  ;;  %v740_v5 = vld.sshfl [vmem:[#allocation1] sm:$0xff pattern:$0x75316420] }
  0xc3   : > { %745 = vrot.lane.b32.xlu1 %v741_v4, %s1263_s11  ;;  %743 = vrot.lane.b32.xlu0 %v740_v5, %s1263_s11  ;;  %756 = vst [vmem:[#allocation1] ss:$2 sm:$0xff] %v1333_v8 }
  0xc5   : > { %v473_v15 = vpop.permute.xlu1 %472  ;;  %v471_v6 = vpop.permute.xlu0 %470  ;;  %v761_v7 = vld.sshfl [vmem:[#allocation1 + $0x10] sm:$0xff pattern:$0x75316420] }
  0xc6   : > { %v478_v9 = vsel %vm476_vm4, %v473_v15, %v475_v46  ;;  %v477_v10 = vsel %vm476_vm4, %v471_v6, %v473_v15  ;;  %778 = vst [vmem:[#allocation1 + $0x11] ss:$2 sm:$0xff] %v1361_v26  ;;  %766 = vrot.lane.b32.xlu2 %v761_v7, %s1264_s12 }
  0xc7   : > { %482 = vst [vmem:[#allocation2 + $0x78] sm:$0xf0] %v478_v9 }
  0xc8   : > { %481 = vst [vmem:[#allocation2 + $0x40] sm:$0xf0] %v477_v10  ;;  %v553_v11 = vpop.permute.xlu2 %552 }
  0xca   : > { %v759_v14 = vld.sshfl [vmem:[#allocation1] sm:$0xff pattern:$0x75316420]  ;;  %v760_v16 = vld.sshfl [vmem:[#allocation1 + $0x8] sm:$0xff pattern:$0x75316420] }
  0xcb   : > { %762 = vrot.lane.b32.xlu1 %v759_v14, %s1264_s12  ;;  %776 = vst [vmem:[#allocation1 + $0x1] ss:$2 sm:$0xff] %v1372_v32 }
  0xcd   : > { %v492_v8 = vpop.permute.xlu1 %491  ;;  %v490_v17 = vpop.permute.xlu0 %489  ;;  %v781_v18 = vld.sshfl [vmem:[#allocation1 + $0x10] sm:$0xff pattern:$0x75316420] }
  0xce   : > { %v497_v20 = vsel %vm495_vm5, %v492_v8, %v494_v54  ;;  %v496_v21 = vsel %vm495_vm5, %v490_v17, %v492_v8  ;;  %797 = vst [vmem:[#allocation1 + $0x10] ss:$2 sm:$0xff] %v1379_v37  ;;  %764 = vrot.lane.b32.xlu2 %v760_v16, %s1264_s12  ;;  %vm768_vm5 = vcmask 506880  }
  0xcf   : > { %501 = vst [vmem:[#allocation2 + $0xa8] sm:$0xf] %v497_v20 }
  0xd0   : > { %500 = vst [vmem:[#allocation2 + $0x80] sm:$0xf] %v496_v21  ;;  %v572_v26 = vpop.permute.xlu2 %571 }
  0xd2   : > { %v779_v22 = vld.sshfl [vmem:[#allocation1] sm:$0xff pattern:$0x75316420]  ;;  %v780_v23 = vld.sshfl [vmem:[#allocation1 + $0x8] sm:$0xff pattern:$0x75316420] }
  0xd3   : > { %782 = vrot.lane.b32.xlu0 %v779_v22, %s1265_s13  ;;  %795 = vst [vmem:[#allocation1] ss:$2 sm:$0xff] %v1387_v41 }
  0xd5   : > { %v800_v32 = vld.sshfl [vmem:[#allocation1 + $0x10] sm:$0xff pattern:$0x75316420]  ;;  %v512_v27 = vpop.permute.xlu1 %511  ;;  %v510_v28 = vpop.permute.xlu0 %509 }
  0xd6   : > { %805 = vrot.lane.b32.xlu1 %v800_v32, %s1266_s14  ;;  %v517_v29 = vsel %vm515_vm6, %v512_v27, %v514_v44  ;;  %v516_v31 = vsel %vm515_vm6, %v510_v28, %v512_v27  ;;  %786 = vrot.lane.b32.xlu2 %v781_v18, %s1265_s13  ;;  %vm729_vm6 = vcmask 523264  }
  0xd7   : > { %521 = vst [vmem:[#allocation2 + $0xa8] sm:$0xf0] %v517_v29 }
  0xd8   : > { %520 = vst [vmem:[#allocation2 + $0x80] sm:$0xf0] %v516_v31  ;;  %v592_v37 = vpop.permute.xlu2 %591 }
  0xda   : > { %v798_v33 = vld.sshfl [vmem:[#allocation1] sm:$0xff pattern:$0x75316420]  ;;  %v799_v45 = vld.sshfl [vmem:[#allocation1 + $0x8] sm:$0xff pattern:$0x75316420] }
  0xdb   : > { %801 = vrot.lane.b32.xlu0 %v798_v33, %s1266_s14 }
  0xdd   : > { %v531_v34 = vpop.permute.xlu1 %530  ;;  %v529_v38 = vpop.permute.xlu0 %528 }
  0xde   : > { %784 = vrot.lane.b32.xlu1 %v780_v23, %s1265_s13  ;;  %v536_v40 = vsel %vm534_vm7, %v531_v34, %v533_v13  ;;  %v535_v41 = vsel %vm534_vm7, %v529_v38, %v531_v34  ;;  %371 = vrot.lane.b32.xlu2 %v1368_v30, %s1267_s15 }
  0xdf   : > { %540 = vst [vmem:[#allocation2 + $0x30] sm:$0xf] %v536_v40 }
  0xe0   : > { %539 = vst [vmem:[#allocation2 + $0x50] sm:$0xf] %v535_v41  ;;  %v611_v46 = vpop.permute.xlu2 %610 }
  0xe3   : > { %803 = vrot.lane.b32.xlu0 %v799_v45, %s1266_s14 }
  0xe5   : > { %v551_v47 = vpop.permute.xlu1 %550  ;;  %v549_v48 = vpop.permute.xlu0 %548 }
  0xe6   : > { %369 = vrot.lane.b32.xlu1 %v1376_v36, %s1267_s15  ;;  %v556_v49 = vsel %vm554_vm8, %v551_v47, %v553_v11  ;;  %v555_v50 = vsel %vm554_vm8, %v549_v48, %v551_v47  ;;  %393 = vrot.lane.b32.xlu2 %v1383_v39, %s1268_s19 }
  0xe7   : > { %560 = vst [vmem:[#allocation2 + $0x30] sm:$0xf0] %v556_v49 }
  0xe8   : > { %559 = vst [vmem:[#allocation2 + $0x50] sm:$0xf0] %v555_v50  ;;  %v631_v30 = vpop.permute.xlu2 %630 }
  0xeb   : > { %367 = vrot.lane.b32.xlu0 %v1374_v35, %s1267_s15 }
  0xed   : > { %v570_v51 = vpop.permute.xlu1 %569  ;;  %v568_v52 = vpop.permute.xlu0 %567 }
  0xee   : > { %391 = vrot.lane.b32.xlu1 %v1391_v43, %s1268_s19  ;;  %v575_v36 = vsel %vm573_vm9, %v570_v51, %v572_v26  ;;  %v574_v53 = vsel %vm573_vm9, %v568_v52, %v570_v51  ;;  %350 = vrot.lane.b32.xlu2 %v1353_v19, %s1269_s20  ;;  %v841_v51 = vld [vmem:[%s1568_s4] sm:$0xf]  ;;  %v1270_v52 = vmov 0  }
  0xef   : > { %579 = vst [vmem:[#allocation2 + $0x70] sm:$0xf] %v575_v36  ;;  %1232 = vset.pattern.permute.xlu0 %v1270_v52  ;;  %1233 = vset.pattern.permute.xlu1 %v1270_v52 }
  0xf0   : > { %578 = vst [vmem:[#allocation2 + $0x88] sm:$0xf] %v574_v53  ;;  %v650_v39 = vpop.permute.xlu2 %649 }
  0xf3   : > { %389 = vrot.lane.b32.xlu0 %v1389_v42, %s1268_s19 }
  0xf5   : > { %v590_v35 = vpop.permute.xlu1 %589  ;;  %v588_v54 = vpop.permute.xlu0 %587 }
  0xf6   : > { %v595_v55 = vsel %vm593_vm10, %v590_v35, %v592_v37  ;;  %v594_v56 = vsel %vm593_vm10, %v588_v54, %v590_v35  ;;  %348 = vrot.lane.b32.xlu1 %v1358_v25, %s1269_s20  ;;  %vm749_vm10 = vcmask 515072  }
  0xf7   : > { %599 = vst [vmem:[#allocation2 + $0x70] sm:$0xf0] %v595_v55 }
  0xf8   : > { %598 = vst [vmem:[#allocation2 + $0x88] sm:$0xf0] %v594_v56  ;;  %v670_v43 = vpop.permute.xlu2 %669 }
  0xfb   : > { %346 = vrot.lane.b32.xlu0 %v1356_v24, %s1269_s20 }
  0xfd   : > { %v609_v19 = vpop.permute.xlu1 %608  ;;  %v607_v57 = vpop.permute.xlu0 %606 }
  0xfe   : > { %v614_v58 = vsel %vm612_vm11, %v609_v19, %v611_v46  ;;  %v613_v59 = vsel %vm612_vm11, %v607_v57, %v609_v19  ;;  %vm788_vm11 = vcmask 498688  }
  0xff   : > { %618 = vst [vmem:[#allocation2 + $0x38] sm:$0xf] %v614_v58 }
 0x100   : > { %617 = vst [vmem:[#allocation2 + $0x8] sm:$0xf] %v613_v59  ;;  %v689_v42 = vpop.permute.xlu2 %688 }
 0x103   : > { %844 = vperm.xlu0 %1232, %v841_v51  }
 0x105   : > { %v629_v60 = vpop.permute.xlu1 %628  ;;  %v627_v61 = vpop.permute.xlu0 %626 }
 0x106   : > { %v634_v44 = vsel %vm632_vm12, %v629_v60, %v631_v30  ;;  %v633_v62 = vsel %vm632_vm12, %v627_v61, %v629_v60  ;;  %vm807_vm12 = vcmask 490496  }
 0x107   : > { %638 = vst [vmem:[#allocation2 + $0x38] sm:$0xf0] %v634_v44 }
 0x108   : > { %637 = vst [vmem:[#allocation2 + $0x8] sm:$0xf0] %v633_v62  ;;  %v709_v25 = vpop.permute.xlu2 %708 }
 0x10d   : > { %v648_v63 = vpop.permute.xlu1 %647  ;;  %v646_v12 = vpop.permute.xlu0 %645 }
 0x10e   : > { %v653_v24 = vsel %vm651_vm13, %v648_v63, %v650_v39  ;;  %v652_v0 = vsel %vm651_vm13, %v646_v12, %v648_v63  ;;  %vm373_vm13 = vcmask 1031168  }
 0x10f   : > { %657 = vst [vmem:[#allocation2 + $0xb8] sm:$0xf] %v653_v24  ;;  %v829_v63 = vld [vmem:[#allocation2 + $0x8] sm:$0xff]  ;;  %v830_v24 = vld [vmem:[#allocation2 + $0x38] sm:$0xff] }
 0x110   : > { %656 = vst [vmem:[#allocation2 + $0x20] sm:$0xf] %v652_v0  ;;  %v728_v1 = vpop.permute.xlu2 %727 }
 0x115   : > { %v668_v2 = vpop.permute.xlu1 %667  ;;  %v666_v3 = vpop.permute.xlu0 %665 }
 0x116   : > { %v673_v13 = vsel %vm671_vm14, %v668_v2, %v670_v43  ;;  %v672_v4 = vsel %vm671_vm14, %v666_v3, %v668_v2  ;;  %vm395_vm14 = vcmask 1022976   ;;  %v828_v2 = vld [vmem:[#allocation2 + $0x70] sm:$0xff] }
 0x117   : > { %677 = vst [vmem:[#allocation2 + $0xb8] sm:$0xf0] %v673_v13  ;;  %v825_v3 = vld [vmem:[#allocation2 + $0x50] sm:$0xff] }
 0x118   : > { %676 = vst [vmem:[#allocation2 + $0x20] sm:$0xf0] %v672_v4  ;;  %v748_v5 = vpop.permute.xlu2 %747  ;;  %v826_v13 = vld [vmem:[#allocation2 + $0x30] sm:$0xff] }
 0x11d   : > { %v687_v15 = vpop.permute.xlu1 %686  ;;  %v685_v6 = vpop.permute.xlu0 %684 }
 0x11e   : > { %v692_v7 = vsel %vm690_vm15, %v687_v15, %v689_v42  ;;  %v691_v9 = vsel %vm690_vm15, %v685_v6, %v687_v15  ;;  %vm352_vm15 = vcmask 1039360   ;;  %v823_v15 = vld [vmem:[#allocation2 + $0x80] sm:$0xff]  ;;  %v824_v6 = vld [vmem:[#allocation2 + $0xa8] sm:$0xff] }
 0x11f   : > { %696 = vst [vmem:[#allocation2 + $0xc8] sm:$0xf] %v692_v7  ;;  %v831_v44 = vld [vmem:[#allocation2 + $0x20] sm:$0xff] }
 0x120   : > { %695 = vst [vmem:[#allocation2 + $0x58] sm:$0xf] %v691_v9  ;;  %v767_v10 = vpop.permute.xlu2 %766  ;;  %v821_v7 = vld [vmem:[#allocation2 + $0x40] sm:$0xff]  ;;  %v822_v9 = vld [vmem:[#allocation2 + $0x78] sm:$0xff] }
 0x125   : > { %v707_v11 = vpop.permute.xlu1 %706  ;;  %v705_v14 = vpop.permute.xlu0 %704 }
 0x126   : > { %v712_v16 = vsel %vm710_vm1, %v707_v11, %v709_v25  ;;  %v711_v8 = vsel %vm710_vm1, %v705_v14, %v707_v11  ;;  %v832_v25 = vld [vmem:[#allocation2 + $0xb8] sm:$0xff]  ;;  %v820_v11 = vld [vmem:[#allocation2 + $0x28] sm:$0xff]  ;;  %vm847_vm1 = vcmask 818176  }
 0x127   : > { %716 = vst [vmem:[#allocation2 + $0xc8] sm:$0xf0] %v712_v16 }
 0x128   : > { %715 = vst [vmem:[#allocation2 + $0x58] sm:$0xf0] %v711_v8  ;;  %v765_v17 = vpop.permute.xlu2 %764 }
 0x129   : > { %v770_v18 = vsel %vm768_vm5, %v765_v17, %v767_v10  ;;  %v819_v10 = vld [vmem:[#allocation2 + $0x60] sm:$0xff] }
 0x12a   : > { %774 = vst [vmem:[#allocation2 + $0x18] sm:$0xf] %v770_v18 }
 0x12d   : > { %v726_v20 = vpop.permute.xlu1 %725  ;;  %v724_v21 = vpop.permute.xlu0 %723 }
 0x12e   : > { %v731_v26 = vsel %vm729_vm6, %v726_v20, %v728_v1  ;;  %v730_v22 = vsel %vm729_vm6, %v724_v21, %v726_v20  ;;  %v834_v42 = vld [vmem:[#allocation2 + $0xc8] sm:$0xff] }
 0x12f   : > { %735 = vst [vmem:[#allocation2 + $0x90] sm:$0xf] %v731_v26  ;;  %v833_v59 = vld [vmem:[#allocation2 + $0x58] sm:$0xff]  ;;  %v827_v1 = vld [vmem:[#allocation2 + $0x88] sm:$0xff] }
 0x130   : > { %734 = vst [vmem:[#allocation2 + $0xa0] sm:$0xf] %v730_v22  ;;  %v787_v34 = vpop.permute.xlu2 %786 }
 0x135   : > { %v746_v23 = vpop.permute.xlu1 %745  ;;  %v744_v32 = vpop.permute.xlu0 %743 }
 0x136   : > { %v751_v27 = vsel %vm749_vm10, %v746_v23, %v748_v5  ;;  %v750_v28 = vsel %vm749_vm10, %v744_v32, %v746_v23 }
 0x137   : > { %755 = vst [vmem:[#allocation2 + $0x90] sm:$0xf0] %v751_v27 }
 0x138   : > { %754 = vst [vmem:[#allocation2 + $0xa0] sm:$0xf0] %v750_v28  ;;  %v372_v46 = vpop.permute.xlu2 %371  ;;  %v1189_v28 = vld [vmem:[%s1566_s2 + $0x2] ss:$4 sm:$0x7] }
 0x13d   : > { %v763_v29 = vpop.permute.xlu1 %762 }
 0x13e   : > { %v769_v31 = vsel %vm768_vm5, %v763_v29, %v765_v17  ;;  %v836_v58 = vld [vmem:[#allocation2 + $0x90] sm:$0xff]  ;;  %v814_v17 = vld [vmem:[%s1567_s3] sm:$0xf]  ;;  %vm903_vm5 = vcmask 138240   ;;  %v926_v29 = vperm.slane %v1189_v28, 2 }
 0x13f   : > { %773 = vst [vmem:[#allocation2 + $0x98] sm:$0xf] %v769_v31  ;;  %v835_v57 = vld [vmem:[#allocation2 + $0xa0] sm:$0xff] }
 0x140   : > { %v394_v53 = vpop.permute.xlu2 %393 }
 0x145   : > { %v783_v37 = vpop.permute.xlu0 %782 }
 0x148   : > { %v806_v33 = vpop.permute.xlu1 %805  ;;  %v351_v62 = vpop.permute.xlu2 %350 }
 0x14d   : > { %v802_v38 = vpop.permute.xlu0 %801 }
 0x150   : > { %v785_v40 = vpop.permute.xlu1 %784 }
 0x151   : > { %v789_v41 = vsel %vm788_vm11, %v783_v37, %v785_v40  ;;  %v790_v45 = vsel %vm788_vm11, %v785_v40, %v787_v34  ;;  %v910_v37 = vld [vmem:[%s1566_s2] ss:$4 sm:$0x7] }
 0x152   : > { %793 = vst [vmem:[#allocation2 + $0x98] sm:$0xf0] %v789_v41  ;;  %v913_v40 = vperm.slane %v910_v37, 1 }
 0x153   : > { %794 = vst [vmem:[#allocation2 + $0x18] sm:$0xf0] %v790_v45 }
 0x155   : > { %v804_v47 = vpop.permute.xlu0 %803 }
 0x156   : > { %v808_v48 = vsel %vm807_vm12, %v802_v38, %v804_v47  ;;  %v809_v49 = vsel %vm807_vm12, %v804_v47, %v806_v33  ;;  %v914_v33 = vperm.slane %v910_v37, 2  ;;  %v912_v38 = vperm.slane %v910_v37, 0 }
 0x157   : > { %812 = vst [vmem:[#allocation2 + $0xc0] sm:$0xf] %v808_v48 }
 0x158   : > { %v370_v50 = vpop.permute.xlu1 %369  ;;  %813 = vst [vmem:[#allocation2 + $0x68] sm:$0xf] %v809_v49 }
 0x159   : > { %v375_v30 = vsel %vm373_vm13, %v370_v50, %v372_v46  ;;  %v837_v56 = vld [vmem:[#allocation2 + $0x98] sm:$0xff] }
 0x15a   : > { %379 = vst [vmem:[#allocation2 + $0x48] sm:$0xf] %v375_v30  ;;  %v838_v19 = vld [vmem:[#allocation2 + $0x18] sm:$0xff]  ;;  %v925_v30 = vperm.slane %v1189_v28, 1 }
 0x15d   : > { %v368_v36 = vpop.permute.xlu0 %367 }
 0x15e   : > { %v374_v39 = vsel %vm373_vm13, %v368_v36, %v370_v50  ;;  %v839_v35 = vld [vmem:[#allocation2 + $0xc0] sm:$0xf]  ;;  %v924_v50 = vperm.slane %v1189_v28, 0 }
 0x15f   : > { %378 = vst [vmem:[#allocation2 + $0x10] sm:$0xf] %v374_v39  ;;  %1185 = vmatpush.msk.msra.mxu0 %vm288_vm0, %v839_v35  ;;  %v840_v54 = vld [vmem:[#allocation2 + $0x68] sm:$0xf] }
 0x160   : > { %v392_v55 = vpop.permute.xlu1 %391  ;;  %1187 = vmatpush.msk.msra.mxu1 %vm288_vm0, %v840_v54 }
 0x161   : > { %v397_v43 = vsel %vm395_vm14, %v392_v55, %v394_v53  ;;  %861 = vmatpush.msra.mxu0 %v837_v56 }
 0x162   : > { %401 = vst [vmem:[#allocation2 + $0x48] sm:$0xf0] %v397_v43  ;;  %881 = vmatpush.msra.mxu1 %v838_v19 }
 0x163   : > { %862 = vmatpush.msra.mxu0 %v835_v57 }
 0x164   : > { %882 = vmatpush.msra.mxu1 %v836_v58 }
 0x165   : > { %863 = vmatpush.msra.mxu0 %v833_v59  ;;  %v390_v60 = vpop.permute.xlu0 %389 }
 0x166   : > { %883 = vmatpush.msra.mxu1 %v834_v42  ;;  %v396_v61 = vsel %vm395_vm14, %v390_v60, %v392_v55 }
 0x167   : > { %400 = vst [vmem:[#allocation2 + $0x10] sm:$0xf0] %v396_v61  ;;  %864 = vmatpush.msra.mxu0 %v831_v44 }
 0x168   : > { %884 = vmatpush.msra.mxu1 %v832_v25  ;;  %v349_v12 = vpop.permute.xlu1 %348 }
 0x169   : > { %865 = vmatpush.msra.mxu0 %v829_v63  ;;  %v354_v0 = vsel %vm352_vm15, %v349_v12, %v351_v62  ;;  %v818_v16 = vld [vmem:[#allocation2 + $0x48] sm:$0xff] }
 0x16a   : > { %885 = vmatpush.msra.mxu1 %v830_v24  ;;  %358 = vst [vmem:[#allocation2] sm:$0xf0] %v354_v0 }
 0x16b   : > { %866 = vmatpush.msra.mxu0 %v827_v1 }
 0x16c   : > { %886 = vmatpush.msra.mxu1 %v828_v2 }
 0x16d   : > { %867 = vmatpush.msra.mxu0 %v825_v3  ;;  %v347_v4 = vpop.permute.xlu0 %346 }
 0x16e   : > { %887 = vmatpush.msra.mxu1 %v826_v13  ;;  %v353_v5 = vsel %vm352_vm15, %v347_v4, %v349_v12  ;;  %v817_v14 = vld [vmem:[#allocation2 + $0x10] sm:$0xff] }
 0x16f   : > { %357 = vst [vmem:[#allocation2 + $0xb0] sm:$0xf0] %v353_v5  ;;  %868 = vmatpush.msra.mxu0 %v823_v15 }
 0x170   : > { %888 = vmatpush.msra.mxu1 %v824_v6 }
 0x171   : > { %869 = vmatpush.msra.mxu0 %v821_v7  ;;  %v816_v8 = vld [vmem:[#allocation2] sm:$0xff] }
 0x172   : > { %889 = vmatpush.msra.mxu1 %v822_v9 }
 0x173   : > { %870 = vmatpush.msra.mxu0 %v819_v10 }
 0x174   : > { %890 = vmatpush.msra.mxu1 %v820_v11 }
 0x175   : > { %871 = vmatpush.msra.mxu0 %v817_v14  ;;  %v845_v20 = vpop.permute.xlu0 %844 }
 0x176   : > { %891 = vmatpush.msra.mxu1 %v818_v16  ;;  %v815_v18 = vld [vmem:[#allocation2 + $0xb0] sm:$0xff] }
 0x177   : > { %872 = vmatpush.msra.mxu0 %v815_v18 }
 0x178   : > { %892 = vmatpush.msra.mxu1 %v816_v8  ;;  %1186 = vmatmul.msk.f32.vlgmr.msra.gmra.mxu0 %vm847_vm1, %v814_v17 }
 0x179   : > { %1188 = vmatmul.msk.f32.vlgmr.msra.gmra.mxu1 %vm847_vm1, %v814_v17 }
 0x1f5   : > { %v874_v21 = vpop.f32.mrf.mxu0 }
 0x1f6   : > { %v894_v26 = vpop.f32.mrf.mxu1  ;;  %v875_v22 = vadd.f32 %v874_v21, %v845_v20 }
 0x1f7   : > { %v895_v23 = vadd.f32 %v894_v26, %v845_v20 }
 0x1f8   : > { %899 = vrot.lane.b32.xlu1 %v875_v22, %s1271_s30 }
 0x1f9   : > { %901 = vrot.lane.b32.xlu2 %v895_v23, %s1271_s30 }
 0x253   : > { %v902_v32 = vpop.permute.xlu2 %901 }
 0x254   : > { %v909_v27 = vsel %vm903_vm5, %v902_v32, 0.0 }
 0x255   : > { %989 = vrot.lane.b32.xlu0 %v909_v27, %s1248_s17  ;;  %v932_v31 = vmul.f32 %v926_v29, %v909_v27  ;;  %v920_v34 = vmul.f32 %v914_v33, %v909_v27  ;;  %v939_v47 = vrot.slane %v909_v27, 4 }
 0x257   : > { %v999_v36 = vrot.slane %v932_v31, 4  ;;  %v972_v35 = vrot.slane %v920_v34, 4 }
 0x25d   : > { %1040 = vrot.lane.b32.xlu0 %v932_v31, %s1254_s23 }
 0x265   : > { %1016 = vrot.lane.b32.xlu0 %v920_v34, %s1252_s21  ;;  %v1048_v34 = vld [vmem:[%s1569_s5] sm:$0xff] }
 0x26a   : > { %v900_v41 = vpop.permute.xlu1 %899 }
 0x26b   : > { %v904_v45 = vsel %vm903_vm5, %v900_v41, %v902_v32  ;;  %v908_v46 = vsel %vm903_vm5, 0.0, %v900_v41 }
 0x26c   : > { %985 = vrot.lane.b32.xlu1 %v908_v46, %s1248_s17  ;;  %987 = vrot.lane.b32.xlu2 %v904_v45, %s1248_s17  ;;  %v918_v48 = vmul.f32 %v912_v38, %v908_v46  ;;  %v919_v49 = vmul.f32 %v913_v40, %v904_v45  ;;  %v930_v51 = vmul.f32 %v924_v50, %v908_v46  ;;  %v937_v53 = vrot.slane %v908_v46, 4 }
 0x26d   : > { %1028 = vrot.lane.b32.xlu0 %v939_v47, %s1253_s22  ;;  %v931_v52 = vmul.f32 %v925_v30, %v904_v45  ;;  %v938_v39 = vrot.slane %v904_v45, 4 }
 0x26e   : > { %933 = vst [vmem:[#allocation3 + $0x8] sm:$0xf] %v918_v48  ;;  %v997_v54 = vrot.slane %v930_v51, 4  ;;  %v970_v56 = vrot.slane %v918_v48, 4  ;;  %v971_v43 = vrot.slane %v919_v49, 4 }
 0x26f   : > { %934 = vst [vmem:[#allocation3] sm:$0xf] %v919_v49  ;;  %v998_v55 = vrot.slane %v931_v52, 4 }
 0x274   : > { %1036 = vrot.lane.b32.xlu1 %v930_v51, %s1254_s23  ;;  %1038 = vrot.lane.b32.xlu2 %v931_v52, %s1254_s23 }
 0x275   : > { %959 = vrot.lane.b32.xlu0 %v932_v31, %s1267_s15  ;;  %v1059_v31 = vld [vmem:[%s1570_s6] sm:$0xff] }
 0x27c   : > { %1012 = vrot.lane.b32.xlu1 %v918_v48, %s1252_s21  ;;  %1014 = vrot.lane.b32.xlu2 %v919_v49, %s1252_s21 }
 0x27d   : > { %1004 = vrot.lane.b32.xlu0 %v999_v36, %s1249_s18 }
 0x284   : > { %1024 = vrot.lane.b32.xlu1 %v937_v53, %s1253_s22  ;;  %1026 = vrot.lane.b32.xlu2 %v938_v39, %s1253_s22  ;;  %s1196_s22 = sshll.u32 %s1573_s25, 4 }
 0x285   : > { %977 = vrot.lane.b32.xlu0 %v972_v35, %s1247_s16  ;;  %s278_s13 = scalar_lea.vmem %s1571_s7, %s1196_s22 }
 0x28c   : > { %955 = vrot.lane.b32.xlu1 %v930_v51, %s1267_s15  ;;  %957 = vrot.lane.b32.xlu2 %v931_v52, %s1267_s15 }
 0x28d   : > { %944 = vrot.lane.b32.xlu0 %v939_v47, %s1269_s20 }
 0x294   : > { %1000 = vrot.lane.b32.xlu1 %v997_v54, %s1249_s18  ;;  %1002 = vrot.lane.b32.xlu2 %v998_v55, %s1249_s18 }
 0x29c   : > { %973 = vrot.lane.b32.xlu1 %v970_v56, %s1247_s16  ;;  %975 = vrot.lane.b32.xlu2 %v971_v43, %s1247_s16 }
 0x2a4   : > { %940 = vrot.lane.b32.xlu1 %v937_v53, %s1269_s20  ;;  %942 = vrot.lane.b32.xlu2 %v938_v39, %s1269_s20 }
 0x2ac   : > { %1062 = vperm.xlu1 %1233, %v1059_v31  }
 0x2c6   : > { %v988_v19 = vpop.permute.xlu2 %987 }
 0x2c7   : > { %v990_v57 = vpop.permute.xlu0 %989 }
 0x2c8   : > { %v992_v58 = vsel %vm456_vm3, %v988_v19, %v990_v57 }
 0x2c9   : > { %996 = vst [vmem:[#allocation3 + $0x40] sm:$0xf] %v992_v58 }
 0x2ce   : > { %v1039_v59 = vpop.permute.xlu2 %1038 }
 0x2cf   : > { %v1041_v42 = vpop.permute.xlu0 %1040 }
 0x2d0   : > { %v1043_v60 = vsel %vm573_vm9, %v1039_v59, %v1041_v42 }
 0x2d1   : > { %1047 = vst [vmem:[#allocation3 + $0x18] sm:$0xf] %v1043_v60 }
 0x2d6   : > { %v1015_v61 = vpop.permute.xlu2 %1014 }
 0x2d7   : > { %v1017_v44 = vpop.permute.xlu0 %1016 }
 0x2d8   : > { %v1019_v62 = vsel %vm534_vm7, %v1015_v61, %v1017_v44  ;;  %v1058_v25 = vld [vmem:[#allocation3 + $0x18] sm:$0xf] }
 0x2d9   : > { %1023 = vst [vmem:[#allocation3 + $0x10] sm:$0xf] %v1019_v62  ;;  %1192 = vmatpush.msk.msra.mxu3 %vm288_vm0, %v1058_v25 }
 0x2de   : > { %v986_v63 = vpop.permute.xlu1 %985  ;;  %v1027_v12 = vpop.permute.xlu2 %1026 }
 0x2df   : > { %v1029_v24 = vpop.permute.xlu0 %1028  ;;  %v991_v0 = vsel %vm456_vm3, %v986_v63, %v988_v19 }
 0x2e0   : > { %995 = vst [vmem:[#allocation3 + $0x28] sm:$0xf] %v991_v0  ;;  %v1031_v1 = vsel %vm554_vm8, %v1027_v12, %v1029_v24 }
 0x2e1   : > { %1035 = vst [vmem:[#allocation3 + $0x10] sm:$0xf0] %v1031_v1 }
 0x2e6   : > { %v1037_v2 = vpop.permute.xlu1 %1036  ;;  %v958_v3 = vpop.permute.xlu2 %957 }
 0x2e7   : > { %v960_v13 = vpop.permute.xlu0 %959  ;;  %v1042_v4 = vsel %vm573_vm9, %v1037_v2, %v1039_v59 }
 0x2e8   : > { %1046 = vst [vmem:[#allocation3 + $0x38] sm:$0xf] %v1042_v4  ;;  %v962_v5 = vsel %vm373_vm13, %v958_v3, %v960_v13  ;;  %v1056_v15 = vld [vmem:[#allocation3 + $0x10] sm:$0xff] }
 0x2e9   : > { %966 = vst [vmem:[#allocation3 + $0x20] sm:$0xf] %v962_v5  ;;  %1107 = vmatpush.msra.mxu3 %v1056_v15 }
 0x2ee   : > { %v1013_v6 = vpop.permute.xlu1 %1012  ;;  %v1003_v7 = vpop.permute.xlu2 %1002 }
 0x2ef   : > { %v1005_v9 = vpop.permute.xlu0 %1004  ;;  %v1018_v10 = vsel %vm534_vm7, %v1013_v6, %v1015_v61  ;;  %v1057_v11 = vld [vmem:[#allocation3 + $0x38] sm:$0xf] }
 0x2f0   : > { %1022 = vst [vmem:[#allocation3 + $0x30] sm:$0xf] %v1018_v10  ;;  %v1007_v14 = vsel %vm476_vm4, %v1003_v7, %v1005_v9  ;;  %1190 = vmatpush.msk.msra.mxu2 %vm288_vm0, %v1057_v11  ;;  %vm1065_vm0 = vcmask 293888  }
 0x2f1   : > { %1011 = vst [vmem:[#allocation3 + $0x40] sm:$0xf0] %v1007_v14 }
 0x2f6   : > { %v1025_v16 = vpop.permute.xlu1 %1024  ;;  %v976_v8 = vpop.permute.xlu2 %975 }
 0x2f7   : > { %v978_v17 = vpop.permute.xlu0 %977  ;;  %v1030_v18 = vsel %vm554_vm8, %v1025_v16, %v1027_v12 }
 0x2f8   : > { %1034 = vst [vmem:[#allocation3 + $0x30] sm:$0xf0] %v1030_v18  ;;  %v980_v20 = vsel %vm437_vm2, %v976_v8, %v978_v17  ;;  %v1054_v21 = vld [vmem:[#allocation3 + $0x40] sm:$0xff] }
 0x2f9   : > { %984 = vst [vmem:[#allocation3 + $0x20] sm:$0xf0] %v980_v20  ;;  %1108 = vmatpush.msra.mxu3 %v1054_v21 }
 0x2fe   : > { %v956_v26 = vpop.permute.xlu1 %955  ;;  %v943_v22 = vpop.permute.xlu2 %942 }
 0x2ff   : > { %v945_v23 = vpop.permute.xlu0 %944  ;;  %v961_v32 = vsel %vm373_vm13, %v956_v26, %v958_v3  ;;  %v1055_v27 = vld [vmem:[#allocation3 + $0x30] sm:$0xff] }
 0x300   : > { %965 = vst [vmem:[#allocation3 + $0x48] sm:$0xf] %v961_v32  ;;  %v947_v28 = vsel %vm352_vm15, %v943_v22, %v945_v23  ;;  %1087 = vmatpush.msra.mxu2 %v1055_v27  ;;  %v1052_v29 = vld [vmem:[#allocation3 + $0x20] sm:$0xff] }
 0x301   : > { %951 = vst [vmem:[#allocation3] sm:$0xf0] %v947_v28  ;;  %1109 = vmatpush.msra.mxu3 %v1052_v29 }
 0x306   : > { %v1001_v37 = vpop.permute.xlu1 %1000 }
 0x307   : > { %v1006_v33 = vsel %vm476_vm4, %v1001_v37, %v1003_v7 }
 0x308   : > { %1010 = vst [vmem:[#allocation3 + $0x28] sm:$0xf0] %v1006_v33  ;;  %v1050_v38 = vld [vmem:[#allocation3] sm:$0xff] }
 0x309   : > { %1110 = vmatpush.msra.mxu3 %v1050_v38 }
 0x30a   : > { %1193 = vmatmul.msk.f32.vlgmr.msra.gmra.mxu3 %vm1065_vm0, %v1048_v34 }
 0x30e   : > { %v974_v40 = vpop.permute.xlu1 %973 }
 0x30f   : > { %v979_v41 = vsel %vm437_vm2, %v974_v40, %v976_v8  ;;  %v1053_v45 = vld [vmem:[#allocation3 + $0x28] sm:$0xff] }
 0x310   : > { %983 = vst [vmem:[#allocation3 + $0x48] sm:$0xf0] %v979_v41  ;;  %1088 = vmatpush.msra.mxu2 %v1053_v45 }
 0x316   : > { %v941_v46 = vpop.permute.xlu1 %940 }
 0x317   : > { %v946_v47 = vsel %vm352_vm15, %v941_v46, %v943_v22  ;;  %v1051_v48 = vld [vmem:[#allocation3 + $0x48] sm:$0xff] }
 0x318   : > { %950 = vst [vmem:[#allocation3 + $0x8] sm:$0xf0] %v946_v47  ;;  %1089 = vmatpush.msra.mxu2 %v1051_v48 }
 0x31e   : > { %v1063_v50 = vpop.permute.xlu1 %1062 }
 0x31f   : > { %v1049_v49 = vld [vmem:[#allocation3 + $0x8] sm:$0xff] }
 0x320   : > { %1090 = vmatpush.msra.mxu2 %v1049_v49 }
 0x321   : > { %1191 = vmatmul.msk.f32.vlgmr.msra.gmra.mxu2 %vm1065_vm0, %v1048_v34 }
 0x38d   : > { %v1112_v30 = vpop.f32.mrf.mxu3 }
 0x38e   : > { %v1113_v51 = vadd.f32 %v1112_v30, %v1063_v50 }
 0x390   : > { %1234 = vtanh.f32 %v1113_v51 }
 0x396   : > { %v1235_v52 = vpop.eup %1234 }
 0x397   : > { %1118 = vst [vmem:[%s278_s13 + $0x8] sm:$0xff] %v1235_v52 }
 0x3a4   : > { %v1092_v36 = vpop.f32.mrf.mxu2 }
 0x3a5   : > { %v1093_v53 = vadd.f32 %v1092_v36, %v1063_v50 }
 0x3a7   : > { %1236 = vtanh.f32 %v1093_v53 }
 0x3ad   : > { %v1237_v39 = vpop.eup %1236 }
 0x3ae   : > { %1117 = vst [vmem:[%s278_s13] sm:$0xff] %v1237_v39 }
 0x3af PF: > { %s17_s24 = sadd.s32 1, %s1244_s24  }
 0x3b0   : > { %p14_p4 = scmp.ge.s32.totalorder %s17_s24, 4  }
 0x3b2   :  { %16 = sbr.rel (!%p14_p4) target bundleno = 1 (0x1), region = 118 }

</bundles_post_ra>
